<compile_context>
chip_gen: v5e
topology: v5e:2x2
jax: 0.10.0
libtpu: 0.0.40
codegen_flags: <defaults>
</compile_context>

<pallas_src>
import math

import jax
import jax.numpy as jnp
from jax.experimental import pallas as pl
from jax.experimental.pallas import tpu as pltpu


# ----------------------------------------------------------------------------
# Model hyper-parameters (small, BERT-like, consistent with the module shapes)
# ----------------------------------------------------------------------------
BATCH = 2
SEQ = 8
BS = BATCH * SEQ
HIDDEN = 32
NUM_HEADS = 2
HEAD_DIM = HIDDEN // NUM_HEADS
INTERMEDIATE = 128
NUM_LAYERS = 2
VOCAB = 100
VOCAB_PAD = 128
MAX_POS = 2048          # max_position_embeddings=2048 as in BertConfig(...)
FEATURE_SIZE = 32
POST_FEATURES = 200
POST_PAD = 256          # 200 -> 256 lanes (zero padded)
OUTPUT_SIZE = 4
OUT_PAD = 32            # 4 -> 32 output lanes (zero padded; wrapper slices)
LN_EPS = 1e-12          # BERT default layer_norm_eps
LANE = 128

# ----------------------------------------------------------------------------
# Packed-slab layout.  wmat: [HIDDEN=32, WMAT_COLS] — every matmul weight as a
# 32-row block starting at a multiple of 128 lanes.  wvec: [1, WVEC_COLS] —
# every bias / LN vector starting at a multiple of 128 lanes.
# ----------------------------------------------------------------------------
QKV_COLS = 3 * NUM_HEADS * LANE            # 768  (q_h0|q_h1|k_h0|k_h1|v_h0|v_h1)
AO_COLS = NUM_HEADS * LANE                 # 256  (ao_w.T, head-padded)

COL_QKV = 0
COL_AO = COL_QKV + QKV_COLS                # 768
COL_IW = COL_AO + AO_COLS                  # 1024
COL_FO = COL_IW + INTERMEDIATE             # 1152  (fo_w.T)
LAYER_MAT_COLS = COL_FO + INTERMEDIATE     # 1280
_GM = NUM_LAYERS * LAYER_MAT_COLS          # 2560
COL_WE = _GM                               # word_emb.T  [32, 128]
COL_PE = COL_WE + VOCAB_PAD                # pos+type block, rows 0:16 real
COL_POOL = COL_PE + LANE
COL_FEAT = COL_POOL + LANE
COL_POST = COL_FEAT + LANE
COL_OUT = COL_POST + POST_PAD              # out_w.T  [4 real rows, 200 real cols]
WMAT_COLS = COL_OUT + POST_PAD             # 3584

V_QKV_B = 0                                # 768 wide (head-padded like COL_QKV)
V_I_B = 768
V_AO_B = 896
V_ATT_G = 1024
V_ATT_B = 1152
V_FO_B = 1280
V_FFN_G = 1408
V_FFN_B = 1536
LAYER_VEC_COLS = 1664
_GV = NUM_LAYERS * LAYER_VEC_COLS          # 3328
V_EMB_G = _GV
V_EMB_B = _GV + 128
V_POOL_B = _GV + 256
V_FEAT_B = _GV + 384
V_OUT_B = _GV + 512
V_POST_B = _GV + 640                       # 256 wide
WVEC_COLS = V_POST_B + POST_PAD            # 4224


# ----------------------------------------------------------------------------
# Fused Pallas kernel: embeddings + encoder + pooler + head, all in VMEM
# ----------------------------------------------------------------------------
def fused_model_kernel(ids_ref, mask_ref, wmat_ref, wvec_ref, o_ref):
    f32 = jnp.float32
    scale = 1.0 / math.sqrt(HEAD_DIM)

    def mat(col, cols, rows=HIDDEN):
        return wmat_ref[0:rows, col:col + cols]

    def vec(col, cols):
        return wvec_ref[0:1, col:col + cols]

    def layernorm(h, g, b):
        # One-pass LN: mean and mean-of-squares are independent XLU reductions.
        mu = jnp.mean(h, axis=-1, keepdims=True)
        ms = jnp.mean(h * h, axis=-1, keepdims=True)
        var = ms - mu * mu
        return (h - mu) * jax.lax.rsqrt(var + LN_EPS) * g + b

    # --- embeddings: one-hot word gather on the MXU + pos/type add + LN ---
    ids = ids_ref[...]                                              # [BS, 1] i32
    vocab_iota = jax.lax.broadcasted_iota(jnp.int32, (BS, VOCAB_PAD), 1)
    onehot = (vocab_iota == ids).astype(f32)                        # [BS, 128]
    x = jnp.einsum("mv,hv->mh", onehot, mat(COL_WE, VOCAB_PAD),
                   preferred_element_type=f32)                      # [BS, H]
    x = x + wmat_ref[0:BS, COL_PE:COL_PE + HIDDEN]                  # pos+type (pre-tiled)
    h = layernorm(x, vec(V_EMB_G, HIDDEN), vec(V_EMB_B, HIDDEN))

    # --- additive attention mask built in-kernel: 0 keep, -10000 pad ---
    mask_add = (1.0 - mask_ref[...].astype(f32)) * -10000.0         # [B, S]
    mask3 = mask_add[:, None, :]                                    # [B, 1, S]

    # --- encoder layers (static Python loop, fully unrolled, all in VMEM) ---
    for l in range(NUM_LAYERS):
        cm = l * LAYER_MAT_COLS
        cv = l * LAYER_VEC_COLS

        # fused, head-padded Q/K/V projection: one MXU push, aligned slices
        qkv = jnp.dot(h, mat(cm + COL_QKV, QKV_COLS),
                      preferred_element_type=f32) + vec(cv + V_QKV_B, QKV_COLS)

        ctx_parts = []
        for hd in range(NUM_HEADS):
            def head_block(which, hd=hd):
                j = which * NUM_HEADS + hd
                return qkv[:, j * LANE:(j + 1) * LANE].reshape(BATCH, SEQ, LANE)
            q, k, v = head_block(0), head_block(1), head_block(2)
            # scores contract the last axis of both operands (no k transpose);
            # zero-padded lanes contribute 0.
            s = jnp.einsum("bqd,bkd->bqk", q, k,
                           preferred_element_type=f32) * scale + mask3
            s = s - jnp.max(s, axis=-1, keepdims=True)
            p = jnp.exp(s)
            p = p * pl.reciprocal(jnp.sum(p, axis=-1, keepdims=True), approx=True)
            ctx = jnp.einsum("bqk,bkd->bqd", p, v, preferred_element_type=f32)
            ctx_parts.append(ctx.reshape(BS, LANE))
        ctx_all = jnp.concatenate(ctx_parts, axis=-1)               # [BS, 256]

        # head concat folded into one output projection (ao_w stored transposed)
        attn = jnp.einsum("mk,nk->mn", ctx_all, mat(cm + COL_AO, AO_COLS),
                          preferred_element_type=f32) + vec(cv + V_AO_B, HIDDEN)
        h = layernorm(attn + h, vec(cv + V_ATT_G, HIDDEN), vec(cv + V_ATT_B, HIDDEN))

        inter = jnp.dot(h, mat(cm + COL_IW, INTERMEDIATE),
                        preferred_element_type=f32) + vec(cv + V_I_B, INTERMEDIATE)
        # TODO(synk): HF BERT default is exact erf-GELU; using tanh-approx GELU.
        inter = jax.nn.gelu(inter, approximate=True)
        ff = jnp.einsum("mk,nk->mn", inter, mat(cm + COL_FO, INTERMEDIATE),
                        preferred_element_type=f32) + vec(cv + V_FO_B, HIDDEN)
        h = layernorm(ff + h, vec(cv + V_FFN_G, HIDDEN), vec(cv + V_FFN_B, HIDDEN))

    # --- pooler on CLS tokens (static sublane-aligned slices: rows 0 and 8) ---
    cls = jnp.concatenate([h[b * SEQ:b * SEQ + 1, :] for b in range(BATCH)], axis=0)
    pooled = jnp.tanh(jnp.dot(cls, mat(COL_POOL, HIDDEN),
                              preferred_element_type=f32) + vec(V_POOL_B, HIDDEN))

    # --- head MLP (dropout p=0.3 is identity at inference) ---
    z = jnp.tanh(jnp.dot(pooled, mat(COL_FEAT, FEATURE_SIZE),
                         preferred_element_type=f32) + vec(V_FEAT_B, FEATURE_SIZE))
    z = jnp.maximum(jnp.dot(z, mat(COL_POST, POST_PAD),
                            preferred_element_type=f32) + vec(V_POST_B, POST_PAD), 0.0)
    out = jnp.einsum("mk,nk->mn", z, mat(COL_OUT, POST_PAD),
                     preferred_element_type=f32) + vec(V_OUT_B, OUT_PAD)
    o_ref[...] = out.astype(o_ref.dtype)                            # [B, 32]


@jax.jit
def competitive_model_forward(wmat, wvec, input_ids, attention_mask):
    ids = input_ids.reshape(BS, 1).astype(jnp.int32)
    mask = attention_mask.astype(jnp.int32)
    vmem = pl.BlockSpec(memory_space=pltpu.MemorySpace.VMEM)
    # TODO(synk): if called in a serving loop, prefetch wmat/wvec with a
    # cross-call DMA future instead of re-loading them every call.
    out = pl.pallas_call(
        fused_model_kernel,
        out_shape=jax.ShapeDtypeStruct((BATCH, OUT_PAD), jnp.float32),
        in_specs=[vmem, vmem, vmem, vmem],
        out_specs=vmem,
    )(ids, mask, wmat, wvec)
    return out[:, :OUTPUT_SIZE]


# ----------------------------------------------------------------------------
# Deterministic parameter construction (synthetic weights, no checkpoint)
# ----------------------------------------------------------------------------
def make_params(key):
    ks = iter(jax.random.split(key, 100))

    def init(shape, scale=0.02):
        return scale * jax.random.normal(next(ks), shape, dtype=jnp.float32)

    def per_layer(shape):
        return jnp.stack([init(shape) for _ in range(NUM_LAYERS)])

    return {
        # BertEmbeddings
        "word_emb": init((VOCAB, HIDDEN)),
        "pos_emb": init((MAX_POS, HIDDEN)),
        "type_emb": init((2, HIDDEN)),
        "emb_ln_g": 1.0 + init((HIDDEN,)),
        "emb_ln_b": init((HIDDEN,)),
        # BertEncoder (stacked over layers)
        "wq": per_layer((HIDDEN, HIDDEN)), "bq": per_layer((HIDDEN,)),
        "wk": per_layer((HIDDEN, HIDDEN)), "bk": per_layer((HIDDEN,)),
        "wv": per_layer((HIDDEN, HIDDEN)), "bv": per_layer((HIDDEN,)),
        "ao_w": per_layer((HIDDEN, HIDDEN)), "ao_b": per_layer((HIDDEN,)),
        "attn_ln_g": 1.0 + per_layer((HIDDEN,)), "attn_ln_b": per_layer((HIDDEN,)),
        "i_w": per_layer((HIDDEN, INTERMEDIATE)), "i_b": per_layer((INTERMEDIATE,)),
        "fo_w": per_layer((INTERMEDIATE, HIDDEN)), "fo_b": per_layer((HIDDEN,)),
        "ffn_ln_g": 1.0 + per_layer((HIDDEN,)), "ffn_ln_b": per_layer((HIDDEN,)),
        # BertPooler + head
        "pooler_w": init((HIDDEN, HIDDEN)), "pooler_b": init((HIDDEN,)),
        "feat_w": init((HIDDEN, FEATURE_SIZE)), "feat_b": init((FEATURE_SIZE,)),
        "post_w": init((FEATURE_SIZE, POST_FEATURES)), "post_b": init((POST_FEATURES,)),
        "out_w": init((POST_FEATURES, OUTPUT_SIZE)), "out_b": init((OUTPUT_SIZE,)),
    }


def pack_params(p):
    """Host-side, one-time packing of all weights into two lane-aligned slabs."""
    wmat = jnp.zeros((HIDDEN, WMAT_COLS), jnp.float32)
    wvec = jnp.zeros((1, WVEC_COLS), jnp.float32)

    def set_mat(m, col, val):                     # val: [rows<=32, cols]
        r, c = val.shape
        return m.at[0:r, col:col + c].set(val)

    def set_vec(v, col, val):                     # val: 1-D
        return v.at[0, col:col + val.shape[0]].set(val)

    for l in range(NUM_LAYERS):
        cm = l * LAYER_MAT_COLS
        cv = l * LAYER_VEC_COLS
        # head-padded fused QKV (each (q/k/v, head) block on a 128-lane boundary)
        for wi, (w, b) in enumerate([(p["wq"][l], p["bq"][l]),
                                     (p["wk"][l], p["bk"][l]),
                                     (p["wv"][l], p["bv"][l])]):
            for hd in range(NUM_HEADS):
                j = wi * NUM_HEADS + hd
                wmat = set_mat(wmat, cm + COL_QKV + j * LANE,
                               w[:, hd * HEAD_DIM:(hd + 1) * HEAD_DIM])
                wvec = set_vec(wvec, cv + V_QKV_B + j * LANE,
                               b[hd * HEAD_DIM:(hd + 1) * HEAD_DIM])
        # transposed, head-padded attention output projection
        for hd in range(NUM_HEADS):
            wmat = set_mat(wmat, cm + COL_AO + hd * LANE,
                           p["ao_w"][l][hd * HEAD_DIM:(hd + 1) * HEAD_DIM, :].T)
        wmat = set_mat(wmat, cm + COL_IW, p["i_w"][l])
        wmat = set_mat(wmat, cm + COL_FO, p["fo_w"][l].T)
        wvec = set_vec(wvec, cv + V_I_B, p["i_b"][l])
        wvec = set_vec(wvec, cv + V_AO_B, p["ao_b"][l])
        wvec = set_vec(wvec, cv + V_ATT_G, p["attn_ln_g"][l])
        wvec = set_vec(wvec, cv + V_ATT_B, p["attn_ln_b"][l])
        wvec = set_vec(wvec, cv + V_FO_B, p["fo_b"][l])
        wvec = set_vec(wvec, cv + V_FFN_G, p["ffn_ln_g"][l])
        wvec = set_vec(wvec, cv + V_FFN_B, p["ffn_ln_b"][l])

    # embeddings / pooler / head
    wmat = set_mat(wmat, COL_WE, p["word_emb"].T)                     # [32, 100]
    pe_te = p["pos_emb"][:SEQ] + p["type_emb"][0][None, :]            # [S, H]
    wmat = set_mat(wmat, COL_PE, jnp.tile(pe_te, (BATCH, 1)))         # [BS, H]
    wmat = set_mat(wmat, COL_POOL, p["pooler_w"])
    wmat = set_mat(wmat, COL_FEAT, p["feat_w"])
    wmat = set_mat(wmat, COL_POST, p["post_w"])                       # [32, 200]
    wmat = set_mat(wmat, COL_OUT, p["out_w"].T)                       # [4, 200]

    wvec = set_vec(wvec, V_EMB_G, p["emb_ln_g"])
    wvec = set_vec(wvec, V_EMB_B, p["emb_ln_b"])
    wvec = set_vec(wvec, V_POOL_B, p["pooler_b"])
    wvec = set_vec(wvec, V_FEAT_B, p["feat_b"])
    wvec = set_vec(wvec, V_OUT_B, p["out_b"])
    wvec = set_vec(wvec, V_POST_B, p["post_b"])
    return wmat, wvec


# ----------------------------------------------------------------------------
if __name__ == "__main__":
    key = jax.random.PRNGKey(0)
    pkey, dkey = jax.random.split(key)

    params = make_params(pkey)
    wmat, wvec = pack_params(params)

    input_ids = jax.random.randint(dkey, (BATCH, SEQ), 0, VOCAB, dtype=jnp.int32)
    # mask the last two positions of sequence 1 to exercise the additive mask
    attention_mask = jnp.ones((BATCH, SEQ), dtype=jnp.int32).at[1, 6:].set(0)

    logits = competitive_model_forward(wmat, wvec, input_ids, attention_mask)
    logits = jax.block_until_ready(logits)

    assert logits.shape == (BATCH, OUTPUT_SIZE), logits.shape
    assert bool(jnp.all(jnp.isfinite(logits)))
    print("KERNEL_OK")
</pallas_src>

<mosaic_0001>
module attributes {stable_mosaic.version = 11 : i64} {
  func.func @fused_model_kernel(%arg0: memref<16x1xi32, #tpu.memory_space<vmem>>, %arg1: memref<2x8xi32, #tpu.memory_space<vmem>>, %arg2: memref<32x3584xf32, #tpu.memory_space<vmem>>, %arg3: memref<1x4224xf32, #tpu.memory_space<vmem>>, %arg4: memref<2x32xf32, #tpu.memory_space<vmem>>) attributes {dimension_semantics = [], scalar_prefetch = 0 : i64, scratch_operands = 0 : i64, tpu.core_type = #tpu.core_type<tc>} {
    %c0 = arith.constant 0 : index
    %c0_0 = arith.constant 0 : index
    %0 = vector.load %arg0[%c0, %c0_0] : memref<16x1xi32, #tpu.memory_space<vmem>>, vector<16x1xi32>
    %1 = tpu.iota {dimensions = array<i32: 1>} : vector<16x128xi32>
    %2 = vector.broadcast %0 : vector<16x1xi32> to vector<16x128xi32>
    %3 = arith.cmpi eq, %1, %2 : vector<16x128xi32>
    %4 = arith.extui %3 : vector<16x128xi1> to vector<16x128xi32>
    %5 = arith.sitofp %4 : vector<16x128xi32> to vector<16x128xf32>
    %c0_1 = arith.constant 0 : index
    %c2560 = arith.constant 2560 : index
    %6 = vector.load %arg2[%c0_1, %c2560] : memref<32x3584xf32, #tpu.memory_space<vmem>>, vector<32x128xf32>
    "tpu.trace_start"() <{level = 10 : i32, message = "mv,hv->mh"}> : () -> ()
    %cst = arith.constant dense<0.000000e+00> : vector<16x32xf32>
    %7 = tpu.matmul %5, %6, %cst {dimension_numbers = #tpu.dot_dimension_numbers<[1], [1], [0], [0], [0, 0, 1, 0], [], []>} : vector<16x128xf32>, vector<32x128xf32>, vector<16x32xf32> -> vector<16x32xf32>
    "tpu.trace_stop"() : () -> ()
    %c0_2 = arith.constant 0 : index
    %c2688 = arith.constant 2688 : index
    %8 = vector.load %arg2[%c0_2, %c2688] : memref<32x3584xf32, #tpu.memory_space<vmem>>, vector<16x32xf32>
    %9 = arith.addf %7, %8 : vector<16x32xf32>
    %c0_3 = arith.constant 0 : index
    %c3328 = arith.constant 3328 : index
    %10 = vector.load %arg3[%c0_3, %c3328] : memref<1x4224xf32, #tpu.memory_space<vmem>>, vector<1x32xf32>
    %c0_4 = arith.constant 0 : index
    %c3456 = arith.constant 3456 : index
    %11 = vector.load %arg3[%c0_4, %c3456] : memref<1x4224xf32, #tpu.memory_space<vmem>>, vector<1x32xf32>
    %cst_5 = arith.constant dense<0.000000e+00> : vector<16xf32>
    %12 = vector.multi_reduction <add>, %9, %cst_5 [1] : vector<16x32xf32> to vector<16xf32>
    %13 = vector.shape_cast %12 : vector<16xf32> to vector<16x1xf32>
    %cst_6 = arith.constant 3.200000e+01 : f32
    %14 = vector.broadcast %cst_6 : f32 to vector<16x1xf32>
    %15 = arith.divf %13, %14 : vector<16x1xf32>
    %16 = arith.mulf %9, %9 : vector<16x32xf32>
    %cst_7 = arith.constant dense<0.000000e+00> : vector<16xf32>
    %17 = vector.multi_reduction <add>, %16, %cst_7 [1] : vector<16x32xf32> to vector<16xf32>
    %18 = vector.shape_cast %17 : vector<16xf32> to vector<16x1xf32>
    %cst_8 = arith.constant 3.200000e+01 : f32
    %19 = vector.broadcast %cst_8 : f32 to vector<16x1xf32>
    %20 = arith.divf %18, %19 : vector<16x1xf32>
    %21 = arith.mulf %15, %15 : vector<16x1xf32>
    %22 = arith.subf %20, %21 : vector<16x1xf32>
    %23 = vector.broadcast %15 : vector<16x1xf32> to vector<16x32xf32>
    %24 = arith.subf %9, %23 : vector<16x32xf32>
    %cst_9 = arith.constant 9.99999996E-13 : f32
    %25 = vector.broadcast %cst_9 : f32 to vector<16x1xf32>
    %26 = arith.addf %22, %25 : vector<16x1xf32>
    %27 = math.rsqrt %26 : vector<16x1xf32>
    %28 = vector.broadcast %27 : vector<16x1xf32> to vector<16x32xf32>
    %29 = arith.mulf %24, %28 : vector<16x32xf32>
    %30 = vector.broadcast %10 : vector<1x32xf32> to vector<16x32xf32>
    %31 = arith.mulf %29, %30 : vector<16x32xf32>
    %32 = vector.broadcast %11 : vector<1x32xf32> to vector<16x32xf32>
    %33 = arith.addf %31, %32 : vector<16x32xf32>
    %c0_10 = arith.constant 0 : index
    %c0_11 = arith.constant 0 : index
    %34 = vector.load %arg1[%c0_10, %c0_11] : memref<2x8xi32, #tpu.memory_space<vmem>>, vector<2x8xi32>
    %35 = arith.sitofp %34 : vector<2x8xi32> to vector<2x8xf32>
    %cst_12 = arith.constant 1.000000e+00 : f32
    %36 = vector.broadcast %cst_12 : f32 to vector<2x8xf32>
    %37 = arith.subf %36, %35 : vector<2x8xf32>
    %cst_13 = arith.constant -1.000000e+04 : f32
    %38 = vector.broadcast %cst_13 : f32 to vector<2x8xf32>
    %39 = arith.mulf %37, %38 : vector<2x8xf32>
    %40 = vector.shape_cast %39 : vector<2x8xf32> to vector<2x1x8xf32>
    %c0_14 = arith.constant 0 : index
    %c0_15 = arith.constant 0 : index
    %41 = vector.load %arg2[%c0_14, %c0_15] : memref<32x3584xf32, #tpu.memory_space<vmem>>, vector<32x768xf32>
    %cst_16 = arith.constant dense<0.000000e+00> : vector<16x768xf32>
    %42 = tpu.matmul %33, %41, %cst_16 {dimension_numbers = #tpu.dot_dimension_numbers<[1], [0], [0], [1], [0, 0, 1, 1], [], []>} : vector<16x32xf32>, vector<32x768xf32>, vector<16x768xf32> -> vector<16x768xf32>
    %c0_17 = arith.constant 0 : index
    %c0_18 = arith.constant 0 : index
    %43 = vector.load %arg3[%c0_17, %c0_18] : memref<1x4224xf32, #tpu.memory_space<vmem>>, vector<1x768xf32>
    %44 = vector.broadcast %43 : vector<1x768xf32> to vector<16x768xf32>
    %45 = arith.addf %42, %44 : vector<16x768xf32>
    %46 = vector.extract_strided_slice %45 {offsets = [0, 0], sizes = [16, 128], strides = [1, 1]} : vector<16x768xf32> to vector<16x128xf32>
    %47 = vector.shape_cast %46 : vector<16x128xf32> to vector<2x8x128xf32>
    %48 = vector.extract_strided_slice %45 {offsets = [0, 256], sizes = [16, 128], strides = [1, 1]} : vector<16x768xf32> to vector<16x128xf32>
    %49 = vector.shape_cast %48 : vector<16x128xf32> to vector<2x8x128xf32>
    %50 = vector.extract_strided_slice %45 {offsets = [0, 512], sizes = [16, 128], strides = [1, 1]} : vector<16x768xf32> to vector<16x128xf32>
    %51 = vector.shape_cast %50 : vector<16x128xf32> to vector<2x8x128xf32>
    "tpu.trace_start"() <{level = 10 : i32, message = "bqd,bkd->bqk"}> : () -> ()
    %cst_19 = arith.constant dense<0.000000e+00> : vector<2x8x8xf32>
    %52 = tpu.matmul %47, %49, %cst_19 {dimension_numbers = #tpu.dot_dimension_numbers<[2], [2], [1], [1], [0, 0, 0, 1, 1, 1], [0], [0]>} : vector<2x8x128xf32>, vector<2x8x128xf32>, vector<2x8x8xf32> -> vector<2x8x8xf32>
    "tpu.trace_stop"() : () -> ()
    %cst_20 = arith.constant 2.500000e-01 : f32
    %53 = vector.broadcast %cst_20 : f32 to vector<2x8x8xf32>
    %54 = arith.mulf %52, %53 : vector<2x8x8xf32>
    %55 = vector.broadcast %40 : vector<2x1x8xf32> to vector<2x8x8xf32>
    %56 = arith.addf %54, %55 : vector<2x8x8xf32>
    %cst_21 = arith.constant dense<0xFF800000> : vector<2x8xf32>
    %57 = vector.multi_reduction <maximumf>, %56, %cst_21 [2] : vector<2x8x8xf32> to vector<2x8xf32>
    %58 = vector.shape_cast %57 : vector<2x8xf32> to vector<2x8x1xf32>
    %59 = vector.broadcast %58 : vector<2x8x1xf32> to vector<2x8x8xf32>
    %60 = arith.subf %56, %59 : vector<2x8x8xf32>
    %61 = math.exp %60 : vector<2x8x8xf32>
    %cst_22 = arith.constant dense<0.000000e+00> : vector<2x8xf32>
    %62 = vector.multi_reduction <add>, %61, %cst_22 [2] : vector<2x8x8xf32> to vector<2x8xf32>
    %63 = vector.shape_cast %62 : vector<2x8xf32> to vector<2x8x1xf32>
    %64 = tpu.reciprocal %63 {approx = true} : vector<2x8x1xf32> -> vector<2x8x1xf32>
    %65 = vector.broadcast %64 : vector<2x8x1xf32> to vector<2x8x8xf32>
    %66 = arith.mulf %61, %65 : vector<2x8x8xf32>
    "tpu.trace_start"() <{level = 10 : i32, message = "bqk,bkd->bqd"}> : () -> ()
    %cst_23 = arith.constant dense<0.000000e+00> : vector<2x8x128xf32>
    %67 = tpu.matmul %66, %51, %cst_23 {dimension_numbers = #tpu.dot_dimension_numbers<[2], [1], [1], [2], [0, 0, 0, 1, 1, 2], [0], [0]>} : vector<2x8x8xf32>, vector<2x8x128xf32>, vector<2x8x128xf32> -> vector<2x8x128xf32>
    "tpu.trace_stop"() : () -> ()
    %68 = vector.shape_cast %67 : vector<2x8x128xf32> to vector<16x128xf32>
    %69 = vector.extract_strided_slice %45 {offsets = [0, 128], sizes = [16, 128], strides = [1, 1]} : vector<16x768xf32> to vector<16x128xf32>
    %70 = vector.shape_cast %69 : vector<16x128xf32> to vector<2x8x128xf32>
    %71 = vector.extract_strided_slice %45 {offsets = [0, 384], sizes = [16, 128], strides = [1, 1]} : vector<16x768xf32> to vector<16x128xf32>
    %72 = vector.shape_cast %71 : vector<16x128xf32> to vector<2x8x128xf32>
    %73 = vector.extract_strided_slice %45 {offsets = [0, 640], sizes = [16, 128], strides = [1, 1]} : vector<16x768xf32> to vector<16x128xf32>
    %74 = vector.shape_cast %73 : vector<16x128xf32> to vector<2x8x128xf32>
    "tpu.trace_start"() <{level = 10 : i32, message = "bqd,bkd->bqk"}> : () -> ()
    %cst_24 = arith.constant dense<0.000000e+00> : vector<2x8x8xf32>
    %75 = tpu.matmul %70, %72, %cst_24 {dimension_numbers = #tpu.dot_dimension_numbers<[2], [2], [1], [1], [0, 0, 0, 1, 1, 1], [0], [0]>} : vector<2x8x128xf32>, vector<2x8x128xf32>, vector<2x8x8xf32> -> vector<2x8x8xf32>
    "tpu.trace_stop"() : () -> ()
    %cst_25 = arith.constant 2.500000e-01 : f32
    %76 = vector.broadcast %cst_25 : f32 to vector<2x8x8xf32>
    %77 = arith.mulf %75, %76 : vector<2x8x8xf32>
    %78 = vector.broadcast %40 : vector<2x1x8xf32> to vector<2x8x8xf32>
    %79 = arith.addf %77, %78 : vector<2x8x8xf32>
    %cst_26 = arith.constant dense<0xFF800000> : vector<2x8xf32>
    %80 = vector.multi_reduction <maximumf>, %79, %cst_26 [2] : vector<2x8x8xf32> to vector<2x8xf32>
    %81 = vector.shape_cast %80 : vector<2x8xf32> to vector<2x8x1xf32>
    %82 = vector.broadcast %81 : vector<2x8x1xf32> to vector<2x8x8xf32>
    %83 = arith.subf %79, %82 : vector<2x8x8xf32>
    %84 = math.exp %83 : vector<2x8x8xf32>
    %cst_27 = arith.constant dense<0.000000e+00> : vector<2x8xf32>
    %85 = vector.multi_reduction <add>, %84, %cst_27 [2] : vector<2x8x8xf32> to vector<2x8xf32>
    %86 = vector.shape_cast %85 : vector<2x8xf32> to vector<2x8x1xf32>
    %87 = tpu.reciprocal %86 {approx = true} : vector<2x8x1xf32> -> vector<2x8x1xf32>
    %88 = vector.broadcast %87 : vector<2x8x1xf32> to vector<2x8x8xf32>
    %89 = arith.mulf %84, %88 : vector<2x8x8xf32>
    "tpu.trace_start"() <{level = 10 : i32, message = "bqk,bkd->bqd"}> : () -> ()
    %cst_28 = arith.constant dense<0.000000e+00> : vector<2x8x128xf32>
    %90 = tpu.matmul %89, %74, %cst_28 {dimension_numbers = #tpu.dot_dimension_numbers<[2], [1], [1], [2], [0, 0, 0, 1, 1, 2], [0], [0]>} : vector<2x8x8xf32>, vector<2x8x128xf32>, vector<2x8x128xf32> -> vector<2x8x128xf32>
    "tpu.trace_stop"() : () -> ()
    %91 = vector.shape_cast %90 : vector<2x8x128xf32> to vector<16x128xf32>
    %92 = tpu.concatenate %68, %91 in 1 : vector<16x128xf32>, vector<16x128xf32> -> vector<16x256xf32>
    %c0_29 = arith.constant 0 : index
    %c768 = arith.constant 768 : index
    %93 = vector.load %arg2[%c0_29, %c768] : memref<32x3584xf32, #tpu.memory_space<vmem>>, vector<32x256xf32>
    "tpu.trace_start"() <{level = 10 : i32, message = "mk,nk->mn"}> : () -> ()
    %cst_30 = arith.constant dense<0.000000e+00> : vector<16x32xf32>
    %94 = tpu.matmul %92, %93, %cst_30 {dimension_numbers = #tpu.dot_dimension_numbers<[1], [1], [0], [0], [0, 0, 1, 0], [], []>} : vector<16x256xf32>, vector<32x256xf32>, vector<16x32xf32> -> vector<16x32xf32>
    "tpu.trace_stop"() : () -> ()
    %c0_31 = arith.constant 0 : index
    %c896 = arith.constant 896 : index
    %95 = vector.load %arg3[%c0_31, %c896] : memref<1x4224xf32, #tpu.memory_space<vmem>>, vector<1x32xf32>
    %96 = vector.broadcast %95 : vector<1x32xf32> to vector<16x32xf32>
    %97 = arith.addf %94, %96 : vector<16x32xf32>
    %98 = arith.addf %97, %33 : vector<16x32xf32>
    %c0_32 = arith.constant 0 : index
    %c1024 = arith.constant 1024 : index
    %99 = vector.load %arg3[%c0_32, %c1024] : memref<1x4224xf32, #tpu.memory_space<vmem>>, vector<1x32xf32>
    %c0_33 = arith.constant 0 : index
    %c1152 = arith.constant 1152 : index
    %100 = vector.load %arg3[%c0_33, %c1152] : memref<1x4224xf32, #tpu.memory_space<vmem>>, vector<1x32xf32>
    %cst_34 = arith.constant dense<0.000000e+00> : vector<16xf32>
    %101 = vector.multi_reduction <add>, %98, %cst_34 [1] : vector<16x32xf32> to vector<16xf32>
    %102 = vector.shape_cast %101 : vector<16xf32> to vector<16x1xf32>
    %cst_35 = arith.constant 3.200000e+01 : f32
    %103 = vector.broadcast %cst_35 : f32 to vector<16x1xf32>
    %104 = arith.divf %102, %103 : vector<16x1xf32>
    %105 = arith.mulf %98, %98 : vector<16x32xf32>
    %cst_36 = arith.constant dense<0.000000e+00> : vector<16xf32>
    %106 = vector.multi_reduction <add>, %105, %cst_36 [1] : vector<16x32xf32> to vector<16xf32>
    %107 = vector.shape_cast %106 : vector<16xf32> to vector<16x1xf32>
    %cst_37 = arith.constant 3.200000e+01 : f32
    %108 = vector.broadcast %cst_37 : f32 to vector<16x1xf32>
    %109 = arith.divf %107, %108 : vector<16x1xf32>
    %110 = arith.mulf %104, %104 : vector<16x1xf32>
    %111 = arith.subf %109, %110 : vector<16x1xf32>
    %112 = vector.broadcast %104 : vector<16x1xf32> to vector<16x32xf32>
    %113 = arith.subf %98, %112 : vector<16x32xf32>
    %cst_38 = arith.constant 9.99999996E-13 : f32
    %114 = vector.broadcast %cst_38 : f32 to vector<16x1xf32>
    %115 = arith.addf %111, %114 : vector<16x1xf32>
    %116 = math.rsqrt %115 : vector<16x1xf32>
    %117 = vector.broadcast %116 : vector<16x1xf32> to vector<16x32xf32>
    %118 = arith.mulf %113, %117 : vector<16x32xf32>
    %119 = vector.broadcast %99 : vector<1x32xf32> to vector<16x32xf32>
    %120 = arith.mulf %118, %119 : vector<16x32xf32>
    %121 = vector.broadcast %100 : vector<1x32xf32> to vector<16x32xf32>
    %122 = arith.addf %120, %121 : vector<16x32xf32>
    %c0_39 = arith.constant 0 : index
    %c1024_40 = arith.constant 1024 : index
    %123 = vector.load %arg2[%c0_39, %c1024_40] : memref<32x3584xf32, #tpu.memory_space<vmem>>, vector<32x128xf32>
    %cst_41 = arith.constant dense<0.000000e+00> : vector<16x128xf32>
    %124 = tpu.matmul %122, %123, %cst_41 {dimension_numbers = #tpu.dot_dimension_numbers<[1], [0], [0], [1], [0, 0, 1, 1], [], []>} : vector<16x32xf32>, vector<32x128xf32>, vector<16x128xf32> -> vector<16x128xf32>
    %c0_42 = arith.constant 0 : index
    %c768_43 = arith.constant 768 : index
    %125 = vector.load %arg3[%c0_42, %c768_43] : memref<1x4224xf32, #tpu.memory_space<vmem>>, vector<1x128xf32>
    %126 = vector.broadcast %125 : vector<1x128xf32> to vector<16x128xf32>
    %127 = arith.addf %124, %126 : vector<16x128xf32>
    %128 = arith.mulf %127, %127 : vector<16x128xf32>
    %129 = arith.mulf %127, %128 : vector<16x128xf32>
    %cst_44 = arith.constant 4.471500e-02 : f32
    %130 = vector.broadcast %cst_44 : f32 to vector<16x128xf32>
    %131 = arith.mulf %130, %129 : vector<16x128xf32>
    %132 = arith.addf %127, %131 : vector<16x128xf32>
    %cst_45 = arith.constant 0.797884583 : f32
    %133 = vector.broadcast %cst_45 : f32 to vector<16x128xf32>
    %134 = arith.mulf %133, %132 : vector<16x128xf32>
    %135 = math.tanh %134 : vector<16x128xf32>
    %cst_46 = arith.constant 1.000000e+00 : f32
    %136 = vector.broadcast %cst_46 : f32 to vector<16x128xf32>
    %137 = arith.addf %136, %135 : vector<16x128xf32>
    %cst_47 = arith.constant 5.000000e-01 : f32
    %138 = vector.broadcast %cst_47 : f32 to vector<16x128xf32>
    %139 = arith.mulf %138, %137 : vector<16x128xf32>
    %140 = arith.mulf %127, %139 : vector<16x128xf32>
    %c0_48 = arith.constant 0 : index
    %c1152_49 = arith.constant 1152 : index
    %141 = vector.load %arg2[%c0_48, %c1152_49] : memref<32x3584xf32, #tpu.memory_space<vmem>>, vector<32x128xf32>
    "tpu.trace_start"() <{level = 10 : i32, message = "mk,nk->mn"}> : () -> ()
    %cst_50 = arith.constant dense<0.000000e+00> : vector<16x32xf32>
    %142 = tpu.matmul %140, %141, %cst_50 {dimension_numbers = #tpu.dot_dimension_numbers<[1], [1], [0], [0], [0, 0, 1, 0], [], []>} : vector<16x128xf32>, vector<32x128xf32>, vector<16x32xf32> -> vector<16x32xf32>
    "tpu.trace_stop"() : () -> ()
    %c0_51 = arith.constant 0 : index
    %c1280 = arith.constant 1280 : index
    %143 = vector.load %arg3[%c0_51, %c1280] : memref<1x4224xf32, #tpu.memory_space<vmem>>, vector<1x32xf32>
    %144 = vector.broadcast %143 : vector<1x32xf32> to vector<16x32xf32>
    %145 = arith.addf %142, %144 : vector<16x32xf32>
    %146 = arith.addf %145, %122 : vector<16x32xf32>
    %c0_52 = arith.constant 0 : index
    %c1408 = arith.constant 1408 : index
    %147 = vector.load %arg3[%c0_52, %c1408] : memref<1x4224xf32, #tpu.memory_space<vmem>>, vector<1x32xf32>
    %c0_53 = arith.constant 0 : index
    %c1536 = arith.constant 1536 : index
    %148 = vector.load %arg3[%c0_53, %c1536] : memref<1x4224xf32, #tpu.memory_space<vmem>>, vector<1x32xf32>
    %cst_54 = arith.constant dense<0.000000e+00> : vector<16xf32>
    %149 = vector.multi_reduction <add>, %146, %cst_54 [1] : vector<16x32xf32> to vector<16xf32>
    %150 = vector.shape_cast %149 : vector<16xf32> to vector<16x1xf32>
    %cst_55 = arith.constant 3.200000e+01 : f32
    %151 = vector.broadcast %cst_55 : f32 to vector<16x1xf32>
    %152 = arith.divf %150, %151 : vector<16x1xf32>
    %153 = arith.mulf %146, %146 : vector<16x32xf32>
    %cst_56 = arith.constant dense<0.000000e+00> : vector<16xf32>
    %154 = vector.multi_reduction <add>, %153, %cst_56 [1] : vector<16x32xf32> to vector<16xf32>
    %155 = vector.shape_cast %154 : vector<16xf32> to vector<16x1xf32>
    %cst_57 = arith.constant 3.200000e+01 : f32
    %156 = vector.broadcast %cst_57 : f32 to vector<16x1xf32>
    %157 = arith.divf %155, %156 : vector<16x1xf32>
    %158 = arith.mulf %152, %152 : vector<16x1xf32>
    %159 = arith.subf %157, %158 : vector<16x1xf32>
    %160 = vector.broadcast %152 : vector<16x1xf32> to vector<16x32xf32>
    %161 = arith.subf %146, %160 : vector<16x32xf32>
    %cst_58 = arith.constant 9.99999996E-13 : f32
    %162 = vector.broadcast %cst_58 : f32 to vector<16x1xf32>
    %163 = arith.addf %159, %162 : vector<16x1xf32>
    %164 = math.rsqrt %163 : vector<16x1xf32>
    %165 = vector.broadcast %164 : vector<16x1xf32> to vector<16x32xf32>
    %166 = arith.mulf %161, %165 : vector<16x32xf32>
    %167 = vector.broadcast %147 : vector<1x32xf32> to vector<16x32xf32>
    %168 = arith.mulf %166, %167 : vector<16x32xf32>
    %169 = vector.broadcast %148 : vector<1x32xf32> to vector<16x32xf32>
    %170 = arith.addf %168, %169 : vector<16x32xf32>
    %c0_59 = arith.constant 0 : index
    %c1280_60 = arith.constant 1280 : index
    %171 = vector.load %arg2[%c0_59, %c1280_60] : memref<32x3584xf32, #tpu.memory_space<vmem>>, vector<32x768xf32>
    %cst_61 = arith.constant dense<0.000000e+00> : vector<16x768xf32>
    %172 = tpu.matmul %170, %171, %cst_61 {dimension_numbers = #tpu.dot_dimension_numbers<[1], [0], [0], [1], [0, 0, 1, 1], [], []>} : vector<16x32xf32>, vector<32x768xf32>, vector<16x768xf32> -> vector<16x768xf32>
    %c0_62 = arith.constant 0 : index
    %c1664 = arith.constant 1664 : index
    %173 = vector.load %arg3[%c0_62, %c1664] : memref<1x4224xf32, #tpu.memory_space<vmem>>, vector<1x768xf32>
    %174 = vector.broadcast %173 : vector<1x768xf32> to vector<16x768xf32>
    %175 = arith.addf %172, %174 : vector<16x768xf32>
    %176 = vector.extract_strided_slice %175 {offsets = [0, 0], sizes = [16, 128], strides = [1, 1]} : vector<16x768xf32> to vector<16x128xf32>
    %177 = vector.shape_cast %176 : vector<16x128xf32> to vector<2x8x128xf32>
    %178 = vector.extract_strided_slice %175 {offsets = [0, 256], sizes = [16, 128], strides = [1, 1]} : vector<16x768xf32> to vector<16x128xf32>
    %179 = vector.shape_cast %178 : vector<16x128xf32> to vector<2x8x128xf32>
    %180 = vector.extract_strided_slice %175 {offsets = [0, 512], sizes = [16, 128], strides = [1, 1]} : vector<16x768xf32> to vector<16x128xf32>
    %181 = vector.shape_cast %180 : vector<16x128xf32> to vector<2x8x128xf32>
    "tpu.trace_start"() <{level = 10 : i32, message = "bqd,bkd->bqk"}> : () -> ()
    %cst_63 = arith.constant dense<0.000000e+00> : vector<2x8x8xf32>
    %182 = tpu.matmul %177, %179, %cst_63 {dimension_numbers = #tpu.dot_dimension_numbers<[2], [2], [1], [1], [0, 0, 0, 1, 1, 1], [0], [0]>} : vector<2x8x128xf32>, vector<2x8x128xf32>, vector<2x8x8xf32> -> vector<2x8x8xf32>
    "tpu.trace_stop"() : () -> ()
    %cst_64 = arith.constant 2.500000e-01 : f32
    %183 = vector.broadcast %cst_64 : f32 to vector<2x8x8xf32>
    %184 = arith.mulf %182, %183 : vector<2x8x8xf32>
    %185 = vector.broadcast %40 : vector<2x1x8xf32> to vector<2x8x8xf32>
    %186 = arith.addf %184, %185 : vector<2x8x8xf32>
    %cst_65 = arith.constant dense<0xFF800000> : vector<2x8xf32>
    %187 = vector.multi_reduction <maximumf>, %186, %cst_65 [2] : vector<2x8x8xf32> to vector<2x8xf32>
    %188 = vector.shape_cast %187 : vector<2x8xf32> to vector<2x8x1xf32>
    %189 = vector.broadcast %188 : vector<2x8x1xf32> to vector<2x8x8xf32>
    %190 = arith.subf %186, %189 : vector<2x8x8xf32>
    %191 = math.exp %190 : vector<2x8x8xf32>
    %cst_66 = arith.constant dense<0.000000e+00> : vector<2x8xf32>
    %192 = vector.multi_reduction <add>, %191, %cst_66 [2] : vector<2x8x8xf32> to vector<2x8xf32>
    %193 = vector.shape_cast %192 : vector<2x8xf32> to vector<2x8x1xf32>
    %194 = tpu.reciprocal %193 {approx = true} : vector<2x8x1xf32> -> vector<2x8x1xf32>
    %195 = vector.broadcast %194 : vector<2x8x1xf32> to vector<2x8x8xf32>
    %196 = arith.mulf %191, %195 : vector<2x8x8xf32>
    "tpu.trace_start"() <{level = 10 : i32, message = "bqk,bkd->bqd"}> : () -> ()
    %cst_67 = arith.constant dense<0.000000e+00> : vector<2x8x128xf32>
    %197 = tpu.matmul %196, %181, %cst_67 {dimension_numbers = #tpu.dot_dimension_numbers<[2], [1], [1], [2], [0, 0, 0, 1, 1, 2], [0], [0]>} : vector<2x8x8xf32>, vector<2x8x128xf32>, vector<2x8x128xf32> -> vector<2x8x128xf32>
    "tpu.trace_stop"() : () -> ()
    %198 = vector.shape_cast %197 : vector<2x8x128xf32> to vector<16x128xf32>
    %199 = vector.extract_strided_slice %175 {offsets = [0, 128], sizes = [16, 128], strides = [1, 1]} : vector<16x768xf32> to vector<16x128xf32>
    %200 = vector.shape_cast %199 : vector<16x128xf32> to vector<2x8x128xf32>
    %201 = vector.extract_strided_slice %175 {offsets = [0, 384], sizes = [16, 128], strides = [1, 1]} : vector<16x768xf32> to vector<16x128xf32>
    %202 = vector.shape_cast %201 : vector<16x128xf32> to vector<2x8x128xf32>
    %203 = vector.extract_strided_slice %175 {offsets = [0, 640], sizes = [16, 128], strides = [1, 1]} : vector<16x768xf32> to vector<16x128xf32>
    %204 = vector.shape_cast %203 : vector<16x128xf32> to vector<2x8x128xf32>
    "tpu.trace_start"() <{level = 10 : i32, message = "bqd,bkd->bqk"}> : () -> ()
    %cst_68 = arith.constant dense<0.000000e+00> : vector<2x8x8xf32>
    %205 = tpu.matmul %200, %202, %cst_68 {dimension_numbers = #tpu.dot_dimension_numbers<[2], [2], [1], [1], [0, 0, 0, 1, 1, 1], [0], [0]>} : vector<2x8x128xf32>, vector<2x8x128xf32>, vector<2x8x8xf32> -> vector<2x8x8xf32>
    "tpu.trace_stop"() : () -> ()
    %cst_69 = arith.constant 2.500000e-01 : f32
    %206 = vector.broadcast %cst_69 : f32 to vector<2x8x8xf32>
    %207 = arith.mulf %205, %206 : vector<2x8x8xf32>
    %208 = vector.broadcast %40 : vector<2x1x8xf32> to vector<2x8x8xf32>
    %209 = arith.addf %207, %208 : vector<2x8x8xf32>
    %cst_70 = arith.constant dense<0xFF800000> : vector<2x8xf32>
    %210 = vector.multi_reduction <maximumf>, %209, %cst_70 [2] : vector<2x8x8xf32> to vector<2x8xf32>
    %211 = vector.shape_cast %210 : vector<2x8xf32> to vector<2x8x1xf32>
    %212 = vector.broadcast %211 : vector<2x8x1xf32> to vector<2x8x8xf32>
    %213 = arith.subf %209, %212 : vector<2x8x8xf32>
    %214 = math.exp %213 : vector<2x8x8xf32>
    %cst_71 = arith.constant dense<0.000000e+00> : vector<2x8xf32>
    %215 = vector.multi_reduction <add>, %214, %cst_71 [2] : vector<2x8x8xf32> to vector<2x8xf32>
    %216 = vector.shape_cast %215 : vector<2x8xf32> to vector<2x8x1xf32>
    %217 = tpu.reciprocal %216 {approx = true} : vector<2x8x1xf32> -> vector<2x8x1xf32>
    %218 = vector.broadcast %217 : vector<2x8x1xf32> to vector<2x8x8xf32>
    %219 = arith.mulf %214, %218 : vector<2x8x8xf32>
    "tpu.trace_start"() <{level = 10 : i32, message = "bqk,bkd->bqd"}> : () -> ()
    %cst_72 = arith.constant dense<0.000000e+00> : vector<2x8x128xf32>
    %220 = tpu.matmul %219, %204, %cst_72 {dimension_numbers = #tpu.dot_dimension_numbers<[2], [1], [1], [2], [0, 0, 0, 1, 1, 2], [0], [0]>} : vector<2x8x8xf32>, vector<2x8x128xf32>, vector<2x8x128xf32> -> vector<2x8x128xf32>
    "tpu.trace_stop"() : () -> ()
    %221 = vector.shape_cast %220 : vector<2x8x128xf32> to vector<16x128xf32>
    %222 = tpu.concatenate %198, %221 in 1 : vector<16x128xf32>, vector<16x128xf32> -> vector<16x256xf32>
    %c0_73 = arith.constant 0 : index
    %c2048 = arith.constant 2048 : index
    %223 = vector.load %arg2[%c0_73, %c2048] : memref<32x3584xf32, #tpu.memory_space<vmem>>, vector<32x256xf32>
    "tpu.trace_start"() <{level = 10 : i32, message = "mk,nk->mn"}> : () -> ()
    %cst_74 = arith.constant dense<0.000000e+00> : vector<16x32xf32>
    %224 = tpu.matmul %222, %223, %cst_74 {dimension_numbers = #tpu.dot_dimension_numbers<[1], [1], [0], [0], [0, 0, 1, 0], [], []>} : vector<16x256xf32>, vector<32x256xf32>, vector<16x32xf32> -> vector<16x32xf32>
    "tpu.trace_stop"() : () -> ()
    %c0_75 = arith.constant 0 : index
    %c2560_76 = arith.constant 2560 : index
    %225 = vector.load %arg3[%c0_75, %c2560_76] : memref<1x4224xf32, #tpu.memory_space<vmem>>, vector<1x32xf32>
    %226 = vector.broadcast %225 : vector<1x32xf32> to vector<16x32xf32>
    %227 = arith.addf %224, %226 : vector<16x32xf32>
    %228 = arith.addf %227, %170 : vector<16x32xf32>
    %c0_77 = arith.constant 0 : index
    %c2688_78 = arith.constant 2688 : index
    %229 = vector.load %arg3[%c0_77, %c2688_78] : memref<1x4224xf32, #tpu.memory_space<vmem>>, vector<1x32xf32>
    %c0_79 = arith.constant 0 : index
    %c2816 = arith.constant 2816 : index
    %230 = vector.load %arg3[%c0_79, %c2816] : memref<1x4224xf32, #tpu.memory_space<vmem>>, vector<1x32xf32>
    %cst_80 = arith.constant dense<0.000000e+00> : vector<16xf32>
    %231 = vector.multi_reduction <add>, %228, %cst_80 [1] : vector<16x32xf32> to vector<16xf32>
    %232 = vector.shape_cast %231 : vector<16xf32> to vector<16x1xf32>
    %cst_81 = arith.constant 3.200000e+01 : f32
    %233 = vector.broadcast %cst_81 : f32 to vector<16x1xf32>
    %234 = arith.divf %232, %233 : vector<16x1xf32>
    %235 = arith.mulf %228, %228 : vector<16x32xf32>
    %cst_82 = arith.constant dense<0.000000e+00> : vector<16xf32>
    %236 = vector.multi_reduction <add>, %235, %cst_82 [1] : vector<16x32xf32> to vector<16xf32>
    %237 = vector.shape_cast %236 : vector<16xf32> to vector<16x1xf32>
    %cst_83 = arith.constant 3.200000e+01 : f32
    %238 = vector.broadcast %cst_83 : f32 to vector<16x1xf32>
    %239 = arith.divf %237, %238 : vector<16x1xf32>
    %240 = arith.mulf %234, %234 : vector<16x1xf32>
    %241 = arith.subf %239, %240 : vector<16x1xf32>
    %242 = vector.broadcast %234 : vector<16x1xf32> to vector<16x32xf32>
    %243 = arith.subf %228, %242 : vector<16x32xf32>
    %cst_84 = arith.constant 9.99999996E-13 : f32
    %244 = vector.broadcast %cst_84 : f32 to vector<16x1xf32>
    %245 = arith.addf %241, %244 : vector<16x1xf32>
    %246 = math.rsqrt %245 : vector<16x1xf32>
    %247 = vector.broadcast %246 : vector<16x1xf32> to vector<16x32xf32>
    %248 = arith.mulf %243, %247 : vector<16x32xf32>
    %249 = vector.broadcast %229 : vector<1x32xf32> to vector<16x32xf32>
    %250 = arith.mulf %248, %249 : vector<16x32xf32>
    %251 = vector.broadcast %230 : vector<1x32xf32> to vector<16x32xf32>
    %252 = arith.addf %250, %251 : vector<16x32xf32>
    %c0_85 = arith.constant 0 : index
    %c2304 = arith.constant 2304 : index
    %253 = vector.load %arg2[%c0_85, %c2304] : memref<32x3584xf32, #tpu.memory_space<vmem>>, vector<32x128xf32>
    %cst_86 = arith.constant dense<0.000000e+00> : vector<16x128xf32>
    %254 = tpu.matmul %252, %253, %cst_86 {dimension_numbers = #tpu.dot_dimension_numbers<[1], [0], [0], [1], [0, 0, 1, 1], [], []>} : vector<16x32xf32>, vector<32x128xf32>, vector<16x128xf32> -> vector<16x128xf32>
    %c0_87 = arith.constant 0 : index
    %c2432 = arith.constant 2432 : index
    %255 = vector.load %arg3[%c0_87, %c2432] : memref<1x4224xf32, #tpu.memory_space<vmem>>, vector<1x128xf32>
    %256 = vector.broadcast %255 : vector<1x128xf32> to vector<16x128xf32>
    %257 = arith.addf %254, %256 : vector<16x128xf32>
    %258 = arith.mulf %257, %257 : vector<16x128xf32>
    %259 = arith.mulf %257, %258 : vector<16x128xf32>
    %cst_88 = arith.constant 4.471500e-02 : f32
    %260 = vector.broadcast %cst_88 : f32 to vector<16x128xf32>
    %261 = arith.mulf %260, %259 : vector<16x128xf32>
    %262 = arith.addf %257, %261 : vector<16x128xf32>
    %cst_89 = arith.constant 0.797884583 : f32
    %263 = vector.broadcast %cst_89 : f32 to vector<16x128xf32>
    %264 = arith.mulf %263, %262 : vector<16x128xf32>
    %265 = math.tanh %264 : vector<16x128xf32>
    %cst_90 = arith.constant 1.000000e+00 : f32
    %266 = vector.broadcast %cst_90 : f32 to vector<16x128xf32>
    %267 = arith.addf %266, %265 : vector<16x128xf32>
    %cst_91 = arith.constant 5.000000e-01 : f32
    %268 = vector.broadcast %cst_91 : f32 to vector<16x128xf32>
    %269 = arith.mulf %268, %267 : vector<16x128xf32>
    %270 = arith.mulf %257, %269 : vector<16x128xf32>
    %c0_92 = arith.constant 0 : index
    %c2432_93 = arith.constant 2432 : index
    %271 = vector.load %arg2[%c0_92, %c2432_93] : memref<32x3584xf32, #tpu.memory_space<vmem>>, vector<32x128xf32>
    "tpu.trace_start"() <{level = 10 : i32, message = "mk,nk->mn"}> : () -> ()
    %cst_94 = arith.constant dense<0.000000e+00> : vector<16x32xf32>
    %272 = tpu.matmul %270, %271, %cst_94 {dimension_numbers = #tpu.dot_dimension_numbers<[1], [1], [0], [0], [0, 0, 1, 0], [], []>} : vector<16x128xf32>, vector<32x128xf32>, vector<16x32xf32> -> vector<16x32xf32>
    "tpu.trace_stop"() : () -> ()
    %c0_95 = arith.constant 0 : index
    %c2944 = arith.constant 2944 : index
    %273 = vector.load %arg3[%c0_95, %c2944] : memref<1x4224xf32, #tpu.memory_space<vmem>>, vector<1x32xf32>
    %274 = vector.broadcast %273 : vector<1x32xf32> to vector<16x32xf32>
    %275 = arith.addf %272, %274 : vector<16x32xf32>
    %276 = arith.addf %275, %252 : vector<16x32xf32>
    %c0_96 = arith.constant 0 : index
    %c3072 = arith.constant 3072 : index
    %277 = vector.load %arg3[%c0_96, %c3072] : memref<1x4224xf32, #tpu.memory_space<vmem>>, vector<1x32xf32>
    %c0_97 = arith.constant 0 : index
    %c3200 = arith.constant 3200 : index
    %278 = vector.load %arg3[%c0_97, %c3200] : memref<1x4224xf32, #tpu.memory_space<vmem>>, vector<1x32xf32>
    %cst_98 = arith.constant dense<0.000000e+00> : vector<16xf32>
    %279 = vector.multi_reduction <add>, %276, %cst_98 [1] : vector<16x32xf32> to vector<16xf32>
    %280 = vector.shape_cast %279 : vector<16xf32> to vector<16x1xf32>
    %cst_99 = arith.constant 3.200000e+01 : f32
    %281 = vector.broadcast %cst_99 : f32 to vector<16x1xf32>
    %282 = arith.divf %280, %281 : vector<16x1xf32>
    %283 = arith.mulf %276, %276 : vector<16x32xf32>
    %cst_100 = arith.constant dense<0.000000e+00> : vector<16xf32>
    %284 = vector.multi_reduction <add>, %283, %cst_100 [1] : vector<16x32xf32> to vector<16xf32>
    %285 = vector.shape_cast %284 : vector<16xf32> to vector<16x1xf32>
    %cst_101 = arith.constant 3.200000e+01 : f32
    %286 = vector.broadcast %cst_101 : f32 to vector<16x1xf32>
    %287 = arith.divf %285, %286 : vector<16x1xf32>
    %288 = arith.mulf %282, %282 : vector<16x1xf32>
    %289 = arith.subf %287, %288 : vector<16x1xf32>
    %290 = vector.broadcast %282 : vector<16x1xf32> to vector<16x32xf32>
    %291 = arith.subf %276, %290 : vector<16x32xf32>
    %cst_102 = arith.constant 9.99999996E-13 : f32
    %292 = vector.broadcast %cst_102 : f32 to vector<16x1xf32>
    %293 = arith.addf %289, %292 : vector<16x1xf32>
    %294 = math.rsqrt %293 : vector<16x1xf32>
    %295 = vector.broadcast %294 : vector<16x1xf32> to vector<16x32xf32>
    %296 = arith.mulf %291, %295 : vector<16x32xf32>
    %297 = vector.broadcast %277 : vector<1x32xf32> to vector<16x32xf32>
    %298 = arith.mulf %296, %297 : vector<16x32xf32>
    %299 = vector.broadcast %278 : vector<1x32xf32> to vector<16x32xf32>
    %300 = arith.addf %298, %299 : vector<16x32xf32>
    %301 = vector.extract_strided_slice %300 {offsets = [0, 0], sizes = [1, 32], strides = [1, 1]} : vector<16x32xf32> to vector<1x32xf32>
    %302 = vector.extract_strided_slice %300 {offsets = [8, 0], sizes = [1, 32], strides = [1, 1]} : vector<16x32xf32> to vector<1x32xf32>
    %303 = tpu.concatenate %301, %302 in 0 : vector<1x32xf32>, vector<1x32xf32> -> vector<2x32xf32>
    %c0_103 = arith.constant 0 : index
    %c2816_104 = arith.constant 2816 : index
    %304 = vector.load %arg2[%c0_103, %c2816_104] : memref<32x3584xf32, #tpu.memory_space<vmem>>, vector<32x32xf32>
    %cst_105 = arith.constant dense<0.000000e+00> : vector<2x32xf32>
    %305 = tpu.matmul %303, %304, %cst_105 {dimension_numbers = #tpu.dot_dimension_numbers<[1], [0], [0], [1], [0, 0, 1, 1], [], []>} : vector<2x32xf32>, vector<32x32xf32>, vector<2x32xf32> -> vector<2x32xf32>
    %c0_106 = arith.constant 0 : index
    %c3584 = arith.constant 3584 : index
    %306 = vector.load %arg3[%c0_106, %c3584] : memref<1x4224xf32, #tpu.memory_space<vmem>>, vector<1x32xf32>
    %307 = vector.broadcast %306 : vector<1x32xf32> to vector<2x32xf32>
    %308 = arith.addf %305, %307 : vector<2x32xf32>
    %309 = math.tanh %308 : vector<2x32xf32>
    %c0_107 = arith.constant 0 : index
    %c2944_108 = arith.constant 2944 : index
    %310 = vector.load %arg2[%c0_107, %c2944_108] : memref<32x3584xf32, #tpu.memory_space<vmem>>, vector<32x32xf32>
    %cst_109 = arith.constant dense<0.000000e+00> : vector<2x32xf32>
    %311 = tpu.matmul %309, %310, %cst_109 {dimension_numbers = #tpu.dot_dimension_numbers<[1], [0], [0], [1], [0, 0, 1, 1], [], []>} : vector<2x32xf32>, vector<32x32xf32>, vector<2x32xf32> -> vector<2x32xf32>
    %c0_110 = arith.constant 0 : index
    %c3712 = arith.constant 3712 : index
    %312 = vector.load %arg3[%c0_110, %c3712] : memref<1x4224xf32, #tpu.memory_space<vmem>>, vector<1x32xf32>
    %313 = vector.broadcast %312 : vector<1x32xf32> to vector<2x32xf32>
    %314 = arith.addf %311, %313 : vector<2x32xf32>
    %315 = math.tanh %314 : vector<2x32xf32>
    %c0_111 = arith.constant 0 : index
    %c3072_112 = arith.constant 3072 : index
    %316 = vector.load %arg2[%c0_111, %c3072_112] : memref<32x3584xf32, #tpu.memory_space<vmem>>, vector<32x256xf32>
    %cst_113 = arith.constant dense<0.000000e+00> : vector<2x256xf32>
    %317 = tpu.matmul %315, %316, %cst_113 {dimension_numbers = #tpu.dot_dimension_numbers<[1], [0], [0], [1], [0, 0, 1, 1], [], []>} : vector<2x32xf32>, vector<32x256xf32>, vector<2x256xf32> -> vector<2x256xf32>
    %c0_114 = arith.constant 0 : index
    %c3968 = arith.constant 3968 : index
    %318 = vector.load %arg3[%c0_114, %c3968] : memref<1x4224xf32, #tpu.memory_space<vmem>>, vector<1x256xf32>
    %319 = vector.broadcast %318 : vector<1x256xf32> to vector<2x256xf32>
    %320 = arith.addf %317, %319 : vector<2x256xf32>
    %cst_115 = arith.constant 0.000000e+00 : f32
    %321 = vector.broadcast %cst_115 : f32 to vector<2x256xf32>
    %322 = arith.maximumf %320, %321 : vector<2x256xf32>
    %c0_116 = arith.constant 0 : index
    %c3328_117 = arith.constant 3328 : index
    %323 = vector.load %arg2[%c0_116, %c3328_117] : memref<32x3584xf32, #tpu.memory_space<vmem>>, vector<32x256xf32>
    "tpu.trace_start"() <{level = 10 : i32, message = "mk,nk->mn"}> : () -> ()
    %cst_118 = arith.constant dense<0.000000e+00> : vector<2x32xf32>
    %324 = tpu.matmul %322, %323, %cst_118 {dimension_numbers = #tpu.dot_dimension_numbers<[1], [1], [0], [0], [0, 0, 1, 0], [], []>} : vector<2x256xf32>, vector<32x256xf32>, vector<2x32xf32> -> vector<2x32xf32>
    "tpu.trace_stop"() : () -> ()
    %c0_119 = arith.constant 0 : index
    %c3840 = arith.constant 3840 : index
    %325 = vector.load %arg3[%c0_119, %c3840] : memref<1x4224xf32, #tpu.memory_space<vmem>>, vector<1x32xf32>
    %326 = vector.broadcast %325 : vector<1x32xf32> to vector<2x32xf32>
    %327 = arith.addf %324, %326 : vector<2x32xf32>
    %c0_120 = arith.constant 0 : index
    %c0_121 = arith.constant 0 : index
    %328 = vector.load %arg4[%c0_120, %c0_121] : memref<2x32xf32, #tpu.memory_space<vmem>>, vector<2x32xf32>
    tpu.vector_store %arg4[%c0_120, %c0_121], %327 {strides = array<i32>} : memref<2x32xf32, #tpu.memory_space<vmem>>, vector<2x32xf32>,
    return
  }
}

</mosaic_0001>

<bundles_post_ra>
// kernel: competitive_model_forward.1
= control target key start
LH: loop header
LB: loop body
LE: loop exit
PB: predicated region body
PF: predicated region fallthrough
CT: control target
= control target key end

     0   :  { %9 = vsyncpa [#allocation3], 0  ;;  %s2167_s0 = inlined_call_operand.vmem [shape: s32[16,1], index: 0, kind: input, shape index: {}]   ;;  %s2168_s1 = inlined_call_operand.vmem [shape: s32[2,8], index: 1, kind: input, shape index: {}]   ;;  %s2169_s2 = inlined_call_operand.hbm [shape: f32[32,3584], index: 2, kind: input, shape index: {}]   ;;  %s2170_s3 = inlined_call_operand.hbm [shape: f32[1,4224], index: 3, kind: input, shape index: {}]   ;;  %s2171_s4 = inlined_call_operand.hbm [shape: f32[2,32], index: 4, kind: output, shape index: {}]  }
   0x1   :  { %10 = vsyncpa [#allocation6], 0 }
   0x2   :  { %11 = vsyncpa [#allocation4], 0  ;;  %s20_s17 = sshll.u32 %s2169_s2, 4  ;;  %s1940_s18 = smov [#allocation2]   ;;  %s21_s17 = int_to_ptr.hbm [resolvable:$true] %s20_s17 }
   0x3   :  { %s22_s19 = sshll.u32 %s1940_s18, 4  ;;  %s34_s22 = sshll.u32 %s2170_s3, 4  ;;  %s23_s19 = int_to_ptr.vmem [resolvable:$true] %s22_s19  ;;  %s35_s22 = int_to_ptr.hbm [resolvable:$true] %s34_s22 }
   0x4   :  { %s1941_s23 = smov 3584   ;;  %s1942_s24 = smov 224  }
   0x5   :  { %28 = dma.hbm_to_vmem [thread:$0]  %s21_s17, 14336, %s23_s19, [#allocation3], %s1941_s23, %s1941_s23, %s1942_s24  }
   0x6   :  { %s1943_s25 = smov [#allocation5]  }
   0x7   :  { %s36_s26 = sshll.u32 %s1943_s25, 4  ;;  %s37_s26 = int_to_ptr.vmem [resolvable:$true] %s36_s26 }
   0x8   :  { %39 = dma.hbm_to_vmem [thread:$0]  %s35_s22, 528, %s37_s26, [#allocation6]  }
   0x9   :  { %1934 = dma.done.wait [#allocation3], 14336  }
   0xa   :  { %1935 = vsyncadd [#allocation3], 4294952960 }
   0xb   :  { %1936 = dma.done.wait [#allocation6], 528  }
   0xc   :  { %1937 = vsyncadd [#allocation6], 4294966768  ;;  %v1944_v0 = vmov 0   ;;  %v48_v1 = vld [vmem:[%s2167_s0] sm:$0xff]  ;;  %v49_v4 = vld [vmem:[%s2167_s0 + $0x8] sm:$0xff]  ;;  %v50_v7 = vlaneseq  ;;  %v1945_v10 = vmov 1.0  }
   0xd   :  { %1776 = vset.pattern.permute.xlu0 %v1944_v0  ;;  %v67_v2 = vld [vmem:[#allocation2 + $0x340] sm:$0xff]  ;;  %v68_v12 = vld [vmem:[#allocation2 + $0xa8] sm:$0xff]  ;;  %vm95_vm2 = vcmask 261120   ;;  %v1946_v24 = vmov 32.0   ;;  %v187_v53 = vld [vmem:[#allocation2 + $0x2b0] sm:$0xff]  ;;  %vm397_vm10 = vcmask 64512  }
   0xe   :  { %53 = vperm.xlu0 %1776, %v48_v1   ;;  %82 = vmatpush.xpose.msra.mxu0 %v67_v2  ;;  %v66_v3 = vld [vmem:[#allocation2 + $0x260] sm:$0xff]  ;;  %v51_v8 = vand.u32 127, %v50_v7  ;;  %v69_v16 = vld [vmem:[#allocation2 + $0x188] sm:$0xff]  ;;  %1796 = vrcp.f32 %v1946_v24  ;;  %v188_v54 = vld [vmem:[#allocation2 + $0x2b8] sm:$0xff]  ;;  %s1709_s7 = sshll.u32 %s2171_s4, 4  ;;  %s1710_s7 = int_to_ptr.hbm [resolvable:$true] %s1709_s7 }
   0xf   :  { %v65_v5 = vld [vmem:[#allocation2 + $0x180] sm:$0xff]  ;;  %v186_v31 = vld [vmem:[#allocation2 + $0x2a8] sm:$0xff]  ;;  %v181_v55 = vld [vmem:[#allocation2 + $0x1d0] sm:$0xff] }
  0x10   :  { %v64_v6 = vld [vmem:[#allocation2 + $0xa0] sm:$0xff]  ;;  %246 = vmatpush.msra.mxu2 %v186_v31  ;;  %v180_v34 = vld [vmem:[#allocation2 + $0x1c8] sm:$0xff]  ;;  %1764 = vmatpush.msra.mxu3 %v186_v31  ;;  %v182_v58 = vld [vmem:[#allocation2 + $0x1d8] sm:$0xff] }
  0x11   :  { %v185_v30 = vld [vmem:[#allocation2 + $0x2a0] sm:$0xff]  ;;  %v174_v37 = vld [vmem:[#allocation2 + $0xe8] sm:$0xff]  ;;  %v175_v59 = vld [vmem:[#allocation2 + $0xf0] sm:$0xff] }
  0x12   :  { %83 = vmatpush.xpose.msra.mxu0 %v66_v3  ;;  %223 = vmatpush.msra.mxu1 %v185_v30  ;;  %v179_v33 = vld [vmem:[#allocation2 + $0x1c0] sm:$0xff]  ;;  %v168_v40 = vld [vmem:[#allocation2 + $0x8] sm:$0xff]  ;;  %v176_v60 = vld [vmem:[#allocation2 + $0xf8] sm:$0xff] }
  0x13   :  { %247 = vmatpush.msra.mxu2 %v180_v34  ;;  %v173_v36 = vld [vmem:[#allocation2 + $0xe0] sm:$0xff]  ;;  %1765 = vmatpush.msra.mxu3 %v180_v34  ;;  %v169_v62 = vld [vmem:[#allocation2 + $0x10] sm:$0xff]  ;;  %v170_v63 = vld [vmem:[#allocation2 + $0x18] sm:$0xff] }
  0x14   :  { %v1797_v25 = vpop.eup %1796  ;;  %224 = vmatpush.msra.mxu1 %v179_v33  ;;  %v167_v39 = vld [vmem:[#allocation2] sm:$0xff] }
  0x15   :  { %v103_v26 = vmul.f32 32.0, %v1797_v25  ;;  %vm107_vm3 = vweird.f32 %v1797_v25  ;;  %248 = vmatpush.msra.mxu2 %v174_v37  ;;  %1766 = vmatpush.msra.mxu3 %v174_v37  ;;  %v189_v41 = vld [vmem:[#allocation2 + $0x2c0] sm:$0xff] }
  0x16   :  { %56 = vperm.xlu0 %1776, %v49_v4   ;;  %84 = vmatpush.xpose.msra.mxu0 %v65_v5  ;;  %v183_v46 = vld [vmem:[#allocation2 + $0x1e0] sm:$0xff] }
  0x17   :  { %v104_v27 = vsub.f32 1.0, %v103_v26  ;;  %225 = vmatpush.msra.mxu1 %v173_v36  ;;  %249 = vmatpush.msra.mxu2 %v168_v40  ;;  %v177_v48 = vld [vmem:[#allocation2 + $0x100] sm:$0xff]  ;;  %v190_v26 = vld [vmem:[#allocation2 + $0x2c8] sm:$0xff] }
  0x18   :  { %1767 = vmatpush.msra.mxu3 %v168_v40  ;;  %v171_v51 = vld [vmem:[#allocation2 + $0x20] sm:$0xff] }
  0x19   :  { %v105_v28 = vmul.f32 %v1797_v25, %v104_v27  ;;  %226 = vmatpush.msra.mxu1 %v167_v39  ;;  %315 = vmatpush.msrb.mxu2 %v189_v41  ;;  %v178_v27 = vld [vmem:[#allocation2 + $0x108] sm:$0xff] }
  0x1a   :  { %85 = vmatpush.xpose.msra.mxu0 %v64_v6  ;;  %269 = vmatpush.msrb.mxu3 %v187_v53 }
  0x1b   :  { %v106_v29 = vadd.f32 %v1797_v25, %v105_v28  ;;  %316 = vmatpush.msrb.mxu2 %v183_v46  ;;  %292 = vmatpush.msrb.mxu1 %v188_v54  ;;  %v172_v28 = vld [vmem:[#allocation2 + $0x28] sm:$0xff] }
  0x1c   :  { %270 = vmatpush.msrb.mxu3 %v181_v55 }
  0x1d   :  { %v1999_v35 = vsel %vm107_vm3, %v1797_v25, %v106_v29  ;;  %317 = vmatpush.msrb.mxu2 %v177_v48  ;;  %293 = vmatpush.msrb.mxu1 %v182_v58 }
  0x1e   :  { %271 = vmatpush.msrb.mxu3 %v175_v59 }
  0x1f   :  { %318 = vmatpush.msrb.mxu2 %v171_v51  ;;  %294 = vmatpush.msrb.mxu1 %v176_v60 }
  0x20   :  { %272 = vmatpush.msrb.mxu3 %v169_v62 }
  0x21   :  { %295 = vmatpush.msrb.mxu1 %v170_v63 }
  0x80   :  { %v54_v9 = vpop.permute.xlu0 %53 }
  0x81   :  { %vm58_vm0 = vcmp.eq.s32.totalorder %v51_v8, %v54_v9 }
  0x82   :  { %1722 = vmatmul.msk.f32.vlgmr.msra.gmra.mxu0 %vm58_vm0, %v1945_v10 }
  0x88   :  { %v57_v11 = vpop.permute.xlu0 %56 }
  0x89   :  { %vm59_vm1 = vcmp.eq.s32.totalorder %v51_v8, %v57_v11 }
  0x8a   :  { %1723 = vmatmul.msk.f32.gmra.mxu0 %vm59_vm1, %v1945_v10  ;;  %v1777_v10 = vld [vmem:[#allocation5 + $0x1a] ss:$0 sm:$0xff] }
  0xff   :  { %v87_v13 = vpop.f32.mrf.mxu0 }
 0x100   :  { %v1985_v14 = vadd.f32 %v87_v13, %v68_v12  ;;  %v1778_v13 = vld [vmem:[#allocation5 + $0x1b] ss:$0 sm:$0xff] }
 0x102   :  { %v96_v15 = vsel %vm95_vm2, %v1985_v14, 0.0  ;;  %v111_v17 = vmul.f32 %v1985_v14, %v1985_v14 }
 0x103   :  { %97 = vadd.xlane.f32.xlu2 %v96_v15 }
 0x104   :  { %v113_v20 = vsel %vm95_vm2, %v111_v17, 0.0 }
 0x107   :  { %v90_v18 = vpop.f32.mrf.mxu0 }
 0x108   :  { %v1991_v19 = vadd.f32 %v90_v18, %v69_v16 }
 0x10a   :  { %v99_v21 = vsel %vm95_vm2, %v1991_v19, 0.0  ;;  %v112_v22 = vmul.f32 %v1991_v19, %v1991_v19 }
 0x10b   :  { %114 = vadd.xlane.f32.xlu2 %v113_v20  ;;  %100 = vadd.xlane.f32.xlu1 %v99_v21 }
 0x10c   :  { %v116_v23 = vsel %vm95_vm2, %v112_v22, 0.0 }
 0x113   :  { %117 = vadd.xlane.f32.xlu1 %v116_v23 }
 0x176   :  { %v98_v32 = vpop.xlane.xlu2 %97 }
 0x177   :  { %v109_v38 = vmul.f32 %v1999_v35, %v98_v32  ;;  %v191_v32 = vld [vmem:[#allocation5] sm:$0x3f] }
 0x178   :  { %v197_v33 = vperm.slane %v191_v32, 4  ;;  %v196_v34 = vperm.slane %v191_v32, 3  ;;  %v198_v55 = vperm.slane %v191_v32, 5 }
 0x179   :  { %v121_v44 = vmul.f32 %v109_v38, %v109_v38  ;;  %v125_v9 = vsub.f32 %v1985_v14, %v109_v38  ;;  %v194_v38 = vperm.slane %v191_v32, 1 }
 0x17e   :  { %v115_v42 = vpop.xlane.xlu2 %114  ;;  %v101_v43 = vpop.xlane.xlu1 %100 }
 0x17f   :  { %v119_v45 = vmul.f32 %v115_v42, %v1999_v35  ;;  %v110_v50 = vmul.f32 %v1999_v35, %v101_v43  ;;  %v195_v42 = vperm.slane %v191_v32, 2 }
 0x181   :  { %v123_v47 = vsub.f32 %v119_v45, %v121_v44  ;;  %v122_v56 = vmul.f32 %v110_v50, %v110_v50  ;;  %v126_v22 = vsub.f32 %v1991_v19, %v110_v50  ;;  %v184_v19 = vld [vmem:[#allocation2 + $0x1e8] sm:$0xff]  ;;  %v193_v44 = vperm.slane %v191_v32, 0 }
 0x183   :  { %v127_v49 = vadd.f32 1e-12, %v123_v47 }
 0x185   :  { %1798 = vrsqrt.f32 %v127_v49  ;;  %vm135_vm5 = vweird.f32 %v127_v49 }
 0x186   :  { %v118_v52 = vpop.xlane.xlu1 %117 }
 0x187   :  { %v120_v57 = vmul.f32 %v118_v52, %v1999_v35 }
 0x189   :  { %v124_v61 = vsub.f32 %v120_v57, %v122_v56 }
 0x18b   :  { %v1799_v0 = vpop.eup %1798  ;;  %v128_v1 = vadd.f32 1e-12, %v124_v61  ;;  %v161_v61 = vld [vmem:[%s2168_s1] sm:$0x3]  ;;  %s1947_s1 = smov [#allocation7]  }
 0x18c   :  { %v130_v2 = vmul.f32 %v1799_v0, %v127_v49  ;;  %vm136_vm4 = vweird.f32 %v1799_v0  ;;  %v162_v62 = vcvt.s32.f32 %v161_v61  ;;  %v581_v61 = vld [vmem:[#allocation2 + $0x118] sm:$0xff]  ;;  %s1707_s30 = sshll.u32 %s1947_s1, 4  ;;  %s1708_s30 = int_to_ptr.vmem [resolvable:$true] %s1707_s30 }
 0x18d   :  { %1800 = vrsqrt.f32 %v128_v1  ;;  %vm137_vm6 = vmor %vm135_vm5, %vm136_vm4  ;;  %vm145_vm8 = vweird.f32 %v128_v1 }
 0x18e   :  { %v131_v3 = vmul.f32 %v1799_v0, %v130_v2  ;;  %v163_v63 = vsub.f32 1.0, %v162_v62  ;;  %v579_v62 = vld [vmem:[#allocation2 + $0x38] sm:$0xff] }
 0x190   :  { %v132_v4 = vmul.f32 0.5, %v131_v3 }
 0x192   :  { %v133_v5 = vsub.f32 1.5, %v132_v4 }
 0x193   :  { %v1801_v6 = vpop.eup %1800 }
 0x194   :  { %v134_v7 = vmul.f32 %v1799_v0, %v133_v5  ;;  %v140_v8 = vmul.f32 %v1801_v6, %v128_v1  ;;  %vm146_vm7 = vweird.f32 %v1801_v6 }
 0x195   :  { %vm147_vm9 = vmor %vm145_vm8, %vm146_vm7 }
 0x196   :  { %v138_v11 = vsel %vm137_vm6, %v1799_v0, %v134_v7  ;;  %v141_v12 = vmul.f32 %v1801_v6, %v140_v8  ;;  %v164_v0 = vmul.f32 -10000.0, %v163_v63 }
 0x197   :  { %v149_v15 = vmul.f32 %v138_v11, %v125_v9 }
 0x198   :  { %v142_v16 = vmul.f32 0.5, %v141_v12  ;;  %v2038_v1 = vperm.slane %v164_v0, 0  ;;  %v166_v8 = vrot.slane %v164_v0, 1 }
 0x199   :  { %v154_v17 = vmul.f32 %v1777_v10, %v149_v15 }
 0x19a   :  { %v143_v18 = vsub.f32 1.5, %v142_v16  ;;  %v2044_v11 = vperm.slane %v166_v8, 0 }
 0x19b   :  { %v2006_v20 = vadd.f32 %v1778_v13, %v154_v17 }
 0x19c   :  { %v144_v21 = vmul.f32 %v1801_v6, %v143_v18 }
 0x19d   :  { %1724 = vmatmul.msk.f32.vlgmr.msra.gmra.mxu1 %vm95_vm2, %v2006_v20  ;;  %1726 = vmatmul.msk.f32.vlgmr.msra.gmra.mxu2 %vm95_vm2, %v2006_v20 }
 0x19e   :  { %v148_v14 = vsel %vm147_vm9, %v1801_v6, %v144_v21 }
 0x19f   :  { %v150_v23 = vmul.f32 %v148_v14, %v126_v22 }
 0x1a1   :  { %v155_v24 = vmul.f32 %v1777_v10, %v150_v23 }
 0x1a3   :  { %v2013_v25 = vadd.f32 %v1778_v13, %v155_v24 }
 0x1a5   :  { %1725 = vmatmul.msk.f32.gmra.mxu1 %vm95_vm2, %v2013_v25  ;;  %1727 = vmatmul.msk.f32.vlgmr.msra.gmra.mxu3 %vm95_vm2, %v2013_v25 }
 0x1a6   :  { %1732 = vmatmul.msk.f32.vlgmr.msrb.gmra.mxu2 %vm95_vm2, %v2006_v20  ;;  %338 = vmatpush.msra.mxu3 %v190_v26 }
 0x1a8   :  { %339 = vmatpush.msra.mxu3 %v184_v19 }
 0x1aa   :  { %340 = vmatpush.msra.mxu3 %v178_v27 }
 0x1ac   :  { %341 = vmatpush.msra.mxu3 %v172_v28 }
 0x1ad   :  { %1728 = vmatmul.msk.f32.vlgmr.msrb.gmra.mxu3 %vm95_vm2, %v2006_v20  ;;  %1730 = vmatmul.msk.f32.vlgmr.msrb.gmra.mxu1 %vm95_vm2, %v2006_v20 }
 0x1ae   :  { %1733 = vmatmul.msk.f32.gmra.mxu2 %vm95_vm2, %v2013_v25 }
 0x1b5   :  { %1729 = vmatmul.msk.f32.gmra.mxu3 %vm95_vm2, %v2013_v25  ;;  %1731 = vmatmul.msk.f32.gmra.mxu1 %vm95_vm2, %v2013_v25 }
 0x1bd   :  { %1734 = vmatmul.msk.f32.vlgmr.msra.gmra.mxu3 %vm95_vm2, %v2006_v20 }
 0x1c5   :  { %1735 = vmatmul.msk.f32.gmra.mxu3 %vm95_vm2, %v2013_v25 }
 0x21a   :  { %v228_v29 = vpop.f32.mrf.mxu1 }
 0x21b   :  { %v229_v49 = vadd.f32 %v228_v29, %v193_v44 }
 0x220   :  { %v251_v30 = vpop.f32.mrf.mxu2 }
 0x221   :  { %v252_v43 = vadd.f32 %v251_v30, %v194_v38 }
 0x222   :  { %v231_v31 = vpop.f32.mrf.mxu1 }
 0x223   :  { %v232_v54 = vadd.f32 %v231_v31, %v193_v44  ;;  %v585_v44 = vld [vmem:[#allocation2 + $0x2d8] sm:$0xff] }
 0x228   :  { %v254_v36 = vpop.f32.mrf.mxu3 }
 0x229   :  { %v320_v37 = vpop.f32.mrf.mxu2  ;;  %v255_v58 = vadd.f32 %v254_v36, %v194_v38 }
 0x22a   :  { %v321_v39 = vadd.f32 %v320_v37, %v197_v33  ;;  %v297_v40 = vpop.f32.mrf.mxu1 }
 0x22b   :  { %v298_v41 = vadd.f32 %v297_v40, %v196_v34 }
 0x22c   :  { %438 = vmatpush.msra.mxu1 %v321_v39 }
 0x22d   :  { %481 = vmatpush.xpose.msrb.mxu3 %v298_v41 }
 0x230   :  { %v274_v45 = vpop.f32.mrf.mxu3  ;;  %482 = vmatmul.f32.vlgmr.msrb.gmra.mxu3 %v252_v43  ;;  %v584_v43 = vld [vmem:[#allocation2 + $0x2d0] sm:$0xff] }
 0x231   :  { %v275_v46 = vadd.f32 %v274_v45, %v195_v42  ;;  %v323_v47 = vpop.f32.mrf.mxu2  ;;  %602 = vmatpush.xpose.msra.mxu3 %v584_v43  ;;  %v582_v45 = vld [vmem:[#allocation2 + $0x1f0] sm:$0xff] }
 0x232   :  { %v324_v48 = vadd.f32 %v323_v47, %v197_v33  ;;  %v300_v50 = vpop.f32.mrf.mxu1 }
 0x233   :  { %364 = vmatpush.xpose.msrb.mxu0 %v275_v46  ;;  %v301_v53 = vadd.f32 %v300_v50, %v196_v34  ;;  %v583_v46 = vld [vmem:[#allocation2 + $0x1f8] sm:$0xff] }
 0x234   :  { %461 = vmatpush.msra.mxu2 %v324_v48  ;;  %v580_v48 = vld [vmem:[#allocation2 + $0x110] sm:$0xff] }
 0x235   :  { %603 = vmatpush.xpose.msra.mxu3 %v582_v45 }
 0x236   :  { %365 = vmatmul.f32.vlgmr.msrb.gmra.mxu0 %v229_v49  ;;  %v578_v49 = vld [vmem:[#allocation2 + $0x30] sm:$0xff] }
 0x238   :  { %v277_v51 = vpop.f32.mrf.mxu3 }
 0x239   :  { %v278_v52 = vadd.f32 %v277_v51, %v195_v42  ;;  %604 = vmatpush.xpose.msra.mxu3 %v580_v48  ;;  %v1780_v48 = vld [vmem:[#allocation5 + $0x8] ss:$0 sm:$0xff] }
 0x23b   :  { %384 = vmatpush.xpose.msra.mxu0 %v278_v52 }
 0x23d   :  { %605 = vmatpush.xpose.msra.mxu3 %v578_v49 }
 0x23e   :  { %385 = vmatmul.f32.vlgmr.msra.gmra.mxu0 %v232_v54 }
 0x23f   :  { %501 = vmatpush.xpose.msrb.mxu0 %v301_v53 }
 0x240   :  { %v343_v56 = vpop.f32.mrf.mxu3 }
 0x241   :  { %v344_v57 = vadd.f32 %v343_v56, %v198_v55 }
 0x243   :  { %550 = vmatpush.msrb.mxu1 %v344_v57  ;;  %625 = vmatpush.xpose.msra.mxu0 %v585_v44 }
 0x246   :  { %502 = vmatmul.f32.vlgmr.msrb.gmra.mxu0 %v255_v58 }
 0x247   :  { %626 = vmatpush.xpose.msra.mxu0 %v583_v46 }
 0x248   :  { %v346_v59 = vpop.f32.mrf.mxu3 }
 0x249   :  { %v347_v60 = vadd.f32 %v346_v59, %v198_v55 }
 0x24b   :  { %573 = vmatpush.msrb.mxu2 %v347_v60  ;;  %627 = vmatpush.xpose.msra.mxu0 %v581_v61 }
 0x24f   :  { %628 = vmatpush.xpose.msra.mxu0 %v579_v62 }
 0x2b3   :  { %v366_v2 = vpop.f32.mrf.mxu0  ;;  %v483_v3 = vpop.f32.mrf.mxu3 }
 0x2b4   :  { %v389_v4 = vmul.f32 0.25, %v366_v2  ;;  %v506_v5 = vmul.f32 0.25, %v483_v3 }
 0x2b6   :  { %v395_v6 = vadd.f32 %v2038_v1, %v389_v4  ;;  %v508_v7 = vadd.f32 %v506_v5, %v2038_v1  ;;  %v1779_v4 = vld [vmem:[#allocation5 + $0x7] ss:$0 sm:$0xff] }
 0x2b8   :  { %v398_v9 = vsel %vm397_vm10, %v395_v6, -inf  ;;  %v510_v10 = vsel %vm397_vm10, %v508_v7, -inf }
 0x2b9   :  { %399 = vmax.xlane.f32.xlu0 %v398_v9  ;;  %511 = vmax.xlane.f32.xlu2 %v510_v10 }
 0x2bb   :  { %v386_v12 = vpop.f32.mrf.mxu0 }
 0x2bc   :  { %v390_v13 = vmul.f32 0.25, %v386_v12 }
 0x2be   :  { %v396_v15 = vadd.f32 %v2044_v11, %v390_v13 }
 0x2c0   :  { %v401_v16 = vsel %vm397_vm10, %v396_v15, -inf }
 0x2c1   :  { %402 = vmax.xlane.f32.xlu1 %v401_v16 }
 0x2c3   :  { %v503_v17 = vpop.f32.mrf.mxu0 }
 0x2c4   :  { %v507_v18 = vmul.f32 0.25, %v503_v17 }
 0x2c6   :  { %v509_v21 = vadd.f32 %v507_v18, %v2044_v11 }
 0x2c8   :  { %v513_v22 = vsel %vm397_vm10, %v509_v21, -inf }
 0x2c9   :  { %514 = vmax.xlane.f32.xlu1 %v513_v22 }
 0x32c   :  { %v400_v14 = vpop.xlane.xlu0 %399  ;;  %v512_v23 = vpop.xlane.xlu2 %511 }
 0x32d   :  { %v404_v24 = vsub.f32 %v395_v6, %v400_v14  ;;  %v516_v19 = vsub.f32 %v508_v7, %v512_v23 }
 0x32f   :  { %v406_v26 = vmul.f32 1.442695, %v404_v24  ;;  %v518_v27 = vmul.f32 1.442695, %v516_v19  ;;  %v700_v24 = vld [vmem:[#allocation2 + $0x200] sm:$0xff] }
 0x331   :  { %1802 = vpow2.f32 %v406_v26  ;;  %v699_v26 = vld [vmem:[#allocation2 + $0x120] sm:$0xff] }
 0x332   :  { %1804 = vpow2.f32 %v518_v27  ;;  %v698_v27 = vld [vmem:[#allocation2 + $0x40] sm:$0xff] }
 0x334   :  { %v403_v28 = vpop.xlane.xlu1 %402 }
 0x335   :  { %v405_v29 = vsub.f32 %v396_v15, %v403_v28 }
 0x337   :  { %v1803_v30 = vpop.eup %1802  ;;  %v408_v31 = vmul.f32 1.442695, %v405_v29 }
 0x338   :  { %v410_v32 = vsel %vm397_vm10, %v1803_v30, 0.0  ;;  %v1805_v34 = vpop.eup %1804 }
 0x339   :  { %1806 = vpow2.f32 %v408_v31  ;;  %411 = vadd.xlane.f32.xlu2 %v410_v32  ;;  %v522_v39 = vsel %vm397_vm10, %v1805_v34, 0.0 }
 0x33c   :  { %v515_v33 = vpop.xlane.xlu1 %514 }
 0x33d   :  { %v517_v36 = vsub.f32 %v509_v21, %v515_v33 }
 0x33f   :  { %v1807_v37 = vpop.eup %1806  ;;  %v520_v38 = vmul.f32 1.442695, %v517_v36 }
 0x340   :  { %v413_v40 = vsel %vm397_vm10, %v1807_v37, 0.0 }
 0x341   :  { %1808 = vpow2.f32 %v520_v38  ;;  %523 = vadd.xlane.f32.xlu2 %v522_v39  ;;  %414 = vadd.xlane.f32.xlu1 %v413_v40 }
 0x347   :  { %v1809_v41 = vpop.eup %1808 }
 0x348   :  { %v525_v42 = vsel %vm397_vm10, %v1809_v41, 0.0 }
 0x349   :  { %526 = vadd.xlane.f32.xlu1 %v525_v42 }
 0x3ac   :  { %v412_v47 = vpop.xlane.xlu2 %411 }
 0x3ad   :  { %1810 = vrcp.f32 %v412_v47 }
 0x3b3   :  { %v1811_v50 = vpop.eup %1810 }
 0x3b4   :  { %v418_v51 = vmul.f32 %v1811_v50, %v1803_v30  ;;  %v524_v52 = vpop.xlane.xlu2 %523  ;;  %v415_v53 = vpop.xlane.xlu1 %414 }
 0x3b5   :  { %1812 = vrcp.f32 %v524_v52 }
 0x3b6   :  { %1814 = vrcp.f32 %v415_v53  ;;  %1736 = vmatmul.msk.f32.vlgmr.msra.gmra.mxu1 %vm397_vm10, %v418_v51  ;;  %v1781_v51 = vld [vmem:[#allocation5 + $0x9] ss:$0 sm:$0xff] }
 0x3bb   :  { %v1813_v54 = vpop.eup %1812 }
 0x3bc   :  { %v1815_v55 = vpop.eup %1814  ;;  %v530_v56 = vmul.f32 %v1813_v54, %v1805_v34  ;;  %v527_v57 = vpop.xlane.xlu1 %526 }
 0x3bd   :  { %v419_v58 = vmul.f32 %v1815_v55, %v1807_v37  ;;  %1816 = vrcp.f32 %v527_v57 }
 0x3be   :  { %1738 = vmatmul.msk.f32.vlgmr.msrb.gmra.mxu1 %vm397_vm10, %v530_v56 }
 0x3bf   :  { %1737 = vmatmul.msk.f32.vlgmr.msra.gmra.mxu2 %vm397_vm10, %v419_v58 }
 0x3c3   :  { %v1817_v59 = vpop.eup %1816 }
 0x3c4   :  { %v531_v60 = vmul.f32 %v1817_v59, %v1809_v41 }
 0x3c7   :  { %1739 = vmatmul.msk.f32.vlgmr.msrb.gmra.mxu2 %vm397_vm10, %v531_v60 }
 0x433   :  { %v440_v63 = vpop.f32.mrf.mxu1 }
 0x434   :  { %606 = vmatmul.f32.vlgmr.msra.gmra.mxu3 %v440_v63 }
 0x43b   :  { %v552_v0 = vpop.f32.mrf.mxu1 }
 0x43c   :  { %629 = vmatmul.f32.vlgmr.msra.gmra.mxu0 %v552_v0 }
 0x442   :  { %v463_v2 = vpop.f32.mrf.mxu2 }
 0x443   :  { %609 = vmatmul.f32.gmra.mxu3 %v463_v2  ;;  %v756_v2 = vld [vmem:[#allocation2 + $0x2e8] sm:$0xff] }
 0x444   :  { %773 = vmatpush.xpose.msra.mxu2 %v756_v2 }
 0x44a   :  { %v575_v3 = vpop.f32.mrf.mxu2 }
 0x44b   :  { %632 = vmatmul.f32.gmra.mxu0 %v575_v3  ;;  %v755_v3 = vld [vmem:[#allocation2 + $0x208] sm:$0xff] }
 0x44c   :  { %774 = vmatpush.xpose.msra.mxu2 %v755_v3 }
 0x4b7   :  { %v607_v5 = vpop.f32.mrf.mxu3 }
 0x4b8   :  { %v608_v6 = vadd.f32 %v1779_v4, %v607_v5  ;;  %v753_v5 = vld [vmem:[#allocation2 + $0x48] sm:$0xff] }
 0x4b9   :  { %v630_v7 = vpop.f32.mrf.mxu0 }
 0x4ba   :  { %v631_v8 = vadd.f32 %v630_v7, %v608_v6  ;;  %v1782_v6 = vld [vmem:[#allocation5 + $0x6] ss:$0 sm:$0xff] }
 0x4bc   :  { %v636_v9 = vadd.f32 %v631_v8, %v2006_v20  ;;  %v701_v20 = vld [vmem:[#allocation2 + $0x2e0] sm:$0xff] }
 0x4bd   :  { %724 = vmatpush.msra.mxu1 %v701_v20 }
 0x4be   :  { %v640_v10 = vsel %vm95_vm2, %v636_v9, 0.0  ;;  %v648_v12 = vmul.f32 %v636_v9, %v636_v9 }
 0x4bf   :  { %641 = vadd.xlane.f32.xlu2 %v640_v10  ;;  %725 = vmatpush.msra.mxu1 %v700_v24 }
 0x4c0   :  { %v650_v13 = vsel %vm95_vm2, %v648_v12, 0.0 }
 0x4c1   :  { %651 = vadd.xlane.f32.xlu1 %v650_v13  ;;  %726 = vmatpush.msra.mxu1 %v699_v26 }
 0x4c3   :  { %727 = vmatpush.msra.mxu1 %v698_v27 }
 0x4c6   :  { %v610_v15 = vpop.f32.mrf.mxu3 }
 0x4c7   :  { %v611_v16 = vadd.f32 %v1779_v4, %v610_v15  ;;  %v754_v4 = vld [vmem:[#allocation2 + $0x128] sm:$0xff] }
 0x4c8   :  { %v633_v17 = vpop.f32.mrf.mxu0  ;;  %775 = vmatpush.xpose.msra.mxu2 %v754_v4 }
 0x4c9   :  { %v634_v18 = vadd.f32 %v633_v17, %v611_v16 }
 0x4cb   :  { %v637_v21 = vadd.f32 %v634_v18, %v2013_v25 }
 0x4cc   :  { %776 = vmatpush.xpose.msra.mxu2 %v753_v5 }
 0x4cd   :  { %v643_v22 = vsel %vm95_vm2, %v637_v21, 0.0  ;;  %v649_v14 = vmul.f32 %v637_v21, %v637_v21 }
 0x4ce   :  { %644 = vadd.xlane.f32.xlu2 %v643_v22 }
 0x4cf   :  { %v653_v23 = vsel %vm95_vm2, %v649_v14, 0.0 }
 0x4d0   :  { %654 = vadd.xlane.f32.xlu1 %v653_v23 }
 0x532   :  { %v642_v19 = vpop.xlane.xlu2 %641 }
 0x533   :  { %v646_v28 = vmul.f32 %v642_v19, %v1999_v35 }
 0x534   :  { %v652_v29 = vpop.xlane.xlu1 %651 }
 0x535   :  { %v658_v25 = vmul.f32 %v646_v28, %v646_v28  ;;  %v656_v30 = vmul.f32 %v652_v29, %v1999_v35  ;;  %v662_v47 = vsub.f32 %v636_v9, %v646_v28 }
 0x537   :  { %v660_v31 = vsub.f32 %v656_v30, %v658_v25  ;;  %v1783_v30 = vld [vmem:[#allocation5 + $0xa] ss:$0 sm:$0xff] }
 0x539   :  { %v664_v32 = vadd.f32 1e-12, %v660_v31 }
 0x53b   :  { %1818 = vrsqrt.f32 %v664_v32  ;;  %vm672_vm12 = vweird.f32 %v664_v32 }
 0x541   :  { %v1819_v33 = vpop.eup %1818  ;;  %v645_v34 = vpop.xlane.xlu2 %644 }
 0x542   :  { %v667_v36 = vmul.f32 %v1819_v33, %v664_v32  ;;  %v647_v37 = vmul.f32 %v645_v34, %v1999_v35  ;;  %vm673_vm11 = vweird.f32 %v1819_v33 }
 0x543   :  { %v655_v38 = vpop.xlane.xlu1 %654  ;;  %vm674_vm13 = vmor %vm672_vm12, %vm673_vm11 }
 0x544   :  { %v668_v39 = vmul.f32 %v1819_v33, %v667_v36  ;;  %v659_v40 = vmul.f32 %v647_v37, %v647_v37  ;;  %v657_v41 = vmul.f32 %v655_v38, %v1999_v35  ;;  %v663_v60 = vsub.f32 %v637_v21, %v647_v37 }
 0x546   :  { %v669_v42 = vmul.f32 0.5, %v668_v39  ;;  %v661_v43 = vsub.f32 %v657_v41, %v659_v40 }
 0x548   :  { %v670_v44 = vsub.f32 1.5, %v669_v42  ;;  %v665_v45 = vadd.f32 1e-12, %v661_v43 }
 0x54a   :  { %v671_v46 = vmul.f32 %v1819_v33, %v670_v44  ;;  %1820 = vrsqrt.f32 %v665_v45  ;;  %vm682_vm15 = vweird.f32 %v665_v45  ;;  %v864_v44 = vld [vmem:[#allocation2 + $0x2f0] sm:$0xff] }
 0x54b   :  { %902 = vmatpush.msrb.mxu1 %v864_v44 }
 0x54c   :  { %v675_v49 = vsel %vm674_vm13, %v1819_v33, %v671_v46  ;;  %v866_v46 = vld [vmem:[#allocation2 + $0x300] sm:$0xff] }
 0x54d   :  { %v686_v50 = vmul.f32 %v675_v49, %v662_v47  ;;  %v867_v47 = vld [vmem:[#allocation2 + $0x308] sm:$0xff]  ;;  %948 = vmatpush.msrb.mxu0 %v866_v46  ;;  %v859_v49 = vld [vmem:[#allocation2 + $0x218] sm:$0xff] }
 0x54e   :  { %971 = vmatpush.msrb.mxu2 %v867_v47 }
 0x54f   :  { %v691_v52 = vmul.f32 %v1780_v48, %v686_v50  ;;  %v860_v50 = vld [vmem:[#allocation2 + $0x220] sm:$0xff] }
 0x550   :  { %v1821_v53 = vpop.eup %1820  ;;  %949 = vmatpush.msrb.mxu0 %v860_v50 }
 0x551   :  { %v677_v54 = vmul.f32 %v1821_v53, %v665_v45  ;;  %v696_v55 = vadd.f32 %v1781_v51, %v691_v52  ;;  %vm683_vm14 = vweird.f32 %v1821_v53  ;;  %v865_v45 = vld [vmem:[#allocation2 + $0x2f8] sm:$0xff]  ;;  %v852_v52 = vld [vmem:[#allocation2 + $0x130] sm:$0xff] }
 0x552   :  { %vm684_vm0 = vmor %vm682_vm15, %vm683_vm14  ;;  %925 = vmatpush.msrb.mxu3 %v865_v45 }
 0x553   :  { %v678_v56 = vmul.f32 %v1821_v53, %v677_v54  ;;  %1740 = vmatmul.msk.f32.vlgmr.msra.gmra.mxu1 %vm95_vm2, %v696_v55  ;;  %v854_v54 = vld [vmem:[#allocation2 + $0x140] sm:$0xff] }
 0x554   :  { %926 = vmatpush.msrb.mxu3 %v859_v49  ;;  %950 = vmatpush.msrb.mxu0 %v854_v54 }
 0x555   :  { %v679_v57 = vmul.f32 0.5, %v678_v56 }
 0x557   :  { %v680_v58 = vsub.f32 1.5, %v679_v57  ;;  %v846_v57 = vld [vmem:[#allocation2 + $0x50] sm:$0xff] }
 0x559   :  { %v681_v59 = vmul.f32 %v1821_v53, %v680_v58  ;;  %v847_v58 = vld [vmem:[#allocation2 + $0x58] sm:$0xff] }
 0x55b   :  { %v685_v61 = vsel %vm684_vm0, %v1821_v53, %v681_v59  ;;  %v853_v53 = vld [vmem:[#allocation2 + $0x138] sm:$0xff]  ;;  %v848_v59 = vld [vmem:[#allocation2 + $0x60] sm:$0xff] }
 0x55c   :  { %v687_v62 = vmul.f32 %v685_v61, %v663_v60  ;;  %927 = vmatpush.msrb.mxu3 %v853_v53  ;;  %v849_v61 = vld [vmem:[#allocation2 + $0x68] sm:$0xff]  ;;  %951 = vmatpush.msrb.mxu0 %v848_v59 }
 0x55e   :  { %v692_v63 = vmul.f32 %v1780_v48, %v687_v62  ;;  %v858_v48 = vld [vmem:[#allocation2 + $0x210] sm:$0xff]  ;;  %928 = vmatpush.msrb.mxu3 %v847_v58 }
 0x55f   :  { %903 = vmatpush.msrb.mxu1 %v858_v48 }
 0x560   :  { %v697_v0 = vadd.f32 %v1781_v51, %v692_v63  ;;  %v861_v51 = vld [vmem:[#allocation2 + $0x228] sm:$0xff] }
 0x561   :  { %972 = vmatpush.msrb.mxu2 %v861_v51  ;;  %904 = vmatpush.msrb.mxu1 %v852_v52 }
 0x562   :  { %1741 = vmatmul.msk.f32.gmra.mxu1 %vm95_vm2, %v697_v0 }
 0x563   :  { %905 = vmatpush.msrb.mxu1 %v846_v57 }
 0x5d0   :  { %v729_v7 = vpop.f32.mrf.mxu1 }
 0x5d1   :  { %v730_v8 = vadd.f32 %v1782_v6, %v729_v7 }
 0x5d3   :  { %v735_v9 = vmul.f32 %v730_v8, %v730_v8 }
 0x5d5   :  { %v737_v10 = vmul.f32 %v735_v9, %v730_v8  ;;  %v868_v9 = vld [vmem:[#allocation2 + $0x310] sm:$0xff] }
 0x5d6   :  { %994 = vmatpush.msra.mxu1 %v868_v9 }
 0x5d7   :  { %v739_v12 = vmul.f32 0.044715, %v737_v10  ;;  %v869_v10 = vld [vmem:[#allocation2 + $0x318] sm:$0xff] }
 0x5d8   :  { %1017 = vmatpush.msra.mxu3 %v869_v10 }
 0x5d9   :  { %v741_v13 = vadd.f32 %v739_v12, %v730_v8 }
 0x5db   :  { %v743_v15 = vmul.f32 0.7978846, %v741_v13 }
 0x5dd   :  { %1822 = vtanh.f32 %v743_v15 }
 0x5df   :  { %v732_v16 = vpop.f32.mrf.mxu1 }
 0x5e0   :  { %v733_v17 = vadd.f32 %v1782_v6, %v732_v16  ;;  %v862_v16 = vld [vmem:[#allocation2 + $0x230] sm:$0xff] }
 0x5e1   :  { %995 = vmatpush.msra.mxu1 %v862_v16 }
 0x5e2   :  { %v736_v18 = vmul.f32 %v733_v17, %v733_v17 }
 0x5e3   :  { %v1823_v21 = vpop.eup %1822 }
 0x5e4   :  { %v738_v22 = vmul.f32 %v736_v18, %v733_v17  ;;  %v747_v14 = vadd.f32 1.0, %v1823_v21  ;;  %v856_v18 = vld [vmem:[#allocation2 + $0x150] sm:$0xff] }
 0x5e5   :  { %996 = vmatpush.msra.mxu1 %v856_v18 }
 0x5e6   :  { %v749_v23 = vmul.f32 0.5, %v747_v14  ;;  %v740_v20 = vmul.f32 0.044715, %v738_v22  ;;  %v857_v14 = vld [vmem:[#allocation2 + $0x158] sm:$0xff] }
 0x5e8   :  { %v751_v24 = vmul.f32 %v749_v23, %v730_v8  ;;  %v742_v26 = vadd.f32 %v740_v20, %v733_v17  ;;  %v850_v23 = vld [vmem:[#allocation2 + $0x70] sm:$0xff] }
 0x5e9   :  { %997 = vmatpush.msra.mxu1 %v850_v23 }
 0x5ea   :  { %777 = vmatmul.f32.vlgmr.msra.gmra.mxu2 %v751_v24  ;;  %v744_v19 = vmul.f32 0.7978846, %v742_v26  ;;  %v851_v26 = vld [vmem:[#allocation2 + $0x78] sm:$0xff] }
 0x5ec   :  { %1824 = vtanh.f32 %v744_v19 }
 0x5f2   :  { %v1825_v27 = vpop.eup %1824 }
 0x5f3   :  { %v748_v28 = vadd.f32 1.0, %v1825_v27 }
 0x5f5   :  { %v750_v29 = vmul.f32 0.5, %v748_v28  ;;  %v1784_v28 = vld [vmem:[#allocation5 + $0xb] ss:$0 sm:$0xff] }
 0x5f7   :  { %v752_v25 = vmul.f32 %v750_v29, %v733_v17  ;;  %v863_v17 = vld [vmem:[#allocation2 + $0x238] sm:$0xff] }
 0x5f8   :  { %1018 = vmatpush.msra.mxu3 %v863_v17 }
 0x5f9   :  { %780 = vmatmul.f32.gmra.mxu2 %v752_v25  ;;  %v1785_v25 = vld [vmem:[#allocation5 + $0xc] ss:$0 sm:$0xff] }
 0x5fa   :  { %1019 = vmatpush.msra.mxu3 %v857_v14 }
 0x5fc   :  { %1020 = vmatpush.msra.mxu3 %v851_v26 }
 0x66d   :  { %v778_v31 = vpop.f32.mrf.mxu2 }
 0x66e   :  { %v779_v32 = vadd.f32 %v1783_v30, %v778_v31 }
 0x670   :  { %v2070_v33 = vadd.f32 %v779_v32, %v696_v55  ;;  %v855_v55 = vld [vmem:[#allocation2 + $0x148] sm:$0xff] }
 0x671   :  { %973 = vmatpush.msrb.mxu2 %v855_v55 }
 0x672   :  { %v788_v34 = vsel %vm95_vm2, %v2070_v33, 0.0  ;;  %v796_v36 = vmul.f32 %v2070_v33, %v2070_v33 }
 0x673   :  { %789 = vadd.xlane.f32.xlu2 %v788_v34  ;;  %974 = vmatpush.msrb.mxu2 %v849_v61 }
 0x674   :  { %v798_v37 = vsel %vm95_vm2, %v796_v36, 0.0 }
 0x675   :  { %799 = vadd.xlane.f32.xlu0 %v798_v37 }
 0x67c   :  { %v781_v38 = vpop.f32.mrf.mxu2 }
 0x67d   :  { %v782_v39 = vadd.f32 %v1783_v30, %v781_v38 }
 0x67f   :  { %v2077_v40 = vadd.f32 %v782_v39, %v697_v0 }
 0x681   :  { %v791_v41 = vsel %vm95_vm2, %v2077_v40, 0.0  ;;  %v797_v42 = vmul.f32 %v2077_v40, %v2077_v40 }
 0x682   :  { %792 = vadd.xlane.f32.xlu1 %v791_v41 }
 0x683   :  { %v801_v43 = vsel %vm95_vm2, %v797_v42, 0.0 }
 0x684   :  { %802 = vadd.xlane.f32.xlu2 %v801_v43 }
 0x6e6   :  { %v790_v56 = vpop.xlane.xlu2 %789 }
 0x6e7   :  { %v794_v60 = vmul.f32 %v790_v56, %v1999_v35 }
 0x6e8   :  { %v800_v62 = vpop.xlane.xlu0 %799 }
 0x6e9   :  { %v806_v63 = vmul.f32 %v794_v60, %v794_v60  ;;  %v804_v0 = vmul.f32 %v800_v62, %v1999_v35  ;;  %v810_v27 = vsub.f32 %v2070_v33, %v794_v60 }
 0x6eb   :  { %v808_v2 = vsub.f32 %v804_v0, %v806_v63 }
 0x6ed   :  { %v812_v3 = vadd.f32 1e-12, %v808_v2 }
 0x6ef   :  { %1826 = vrsqrt.f32 %v812_v3  ;;  %vm820_vm3 = vweird.f32 %v812_v3 }
 0x6f5   :  { %v1827_v4 = vpop.eup %1826  ;;  %v793_v5 = vpop.xlane.xlu1 %792 }
 0x6f6   :  { %v815_v6 = vmul.f32 %v1827_v4, %v812_v3  ;;  %v795_v7 = vmul.f32 %v793_v5, %v1999_v35  ;;  %vm821_vm1 = vweird.f32 %v1827_v4 }
 0x6f7   :  { %v803_v8 = vpop.xlane.xlu2 %802  ;;  %vm822_vm4 = vmor %vm820_vm3, %vm821_vm1 }
 0x6f8   :  { %v816_v12 = vmul.f32 %v1827_v4, %v815_v6  ;;  %v807_v13 = vmul.f32 %v795_v7, %v795_v7  ;;  %v805_v15 = vmul.f32 %v803_v8, %v1999_v35  ;;  %v811_v41 = vsub.f32 %v2077_v40, %v795_v7  ;;  %v870_v40 = vld [vmem:[#allocation5 + $0xd] sm:$0x3f] }
 0x6f9   :  { %v874_v46 = vperm.slane %v870_v40, 2  ;;  %v872_v47 = vperm.slane %v870_v40, 0  ;;  %v875_v53 = vperm.slane %v870_v40, 3  ;;  %v876_v60 = vperm.slane %v870_v40, 4 }
 0x6fa   :  { %v817_v21 = vmul.f32 0.5, %v816_v12  ;;  %v809_v22 = vsub.f32 %v805_v15, %v807_v13  ;;  %v873_v2 = vperm.slane %v870_v40, 1  ;;  %v877_v5 = vperm.slane %v870_v40, 5 }
 0x6fc   :  { %v818_v20 = vsub.f32 1.5, %v817_v21  ;;  %v813_v24 = vadd.f32 1e-12, %v809_v22 }
 0x6fe   :  { %v819_v19 = vmul.f32 %v1827_v4, %v818_v20  ;;  %1828 = vrsqrt.f32 %v813_v24  ;;  %vm830_vm6 = vweird.f32 %v813_v24 }
 0x700   :  { %v823_v29 = vsel %vm822_vm4, %v1827_v4, %v819_v19 }
 0x701   :  { %v834_v30 = vmul.f32 %v823_v29, %v810_v27 }
 0x703   :  { %v839_v31 = vmul.f32 %v1784_v28, %v834_v30 }
 0x704   :  { %v1829_v32 = vpop.eup %1828 }
 0x705   :  { %v2089_v34 = vadd.f32 %v1785_v25, %v839_v31  ;;  %v825_v36 = vmul.f32 %v1829_v32, %v813_v24  ;;  %vm831_vm5 = vweird.f32 %v1829_v32 }
 0x706   :  { %vm832_vm7 = vmor %vm830_vm6, %vm831_vm5  ;;  %vm1523_vm5 = vcmask 1040384  }
 0x707   :  { %v826_v37 = vmul.f32 %v1829_v32, %v825_v36  ;;  %1742 = vmatmul.msk.f32.vlgmr.msrb.gmra.mxu1 %vm95_vm2, %v2089_v34  ;;  %1744 = vmatmul.msk.f32.vlgmr.msrb.gmra.mxu3 %vm95_vm2, %v2089_v34 }
 0x708   :  { %1746 = vmatmul.msk.f32.vlgmr.msrb.gmra.mxu0 %vm95_vm2, %v2089_v34  ;;  %1748 = vmatmul.msk.f32.vlgmr.msrb.gmra.mxu2 %vm95_vm2, %v2089_v34 }
 0x709   :  { %v827_v33 = vmul.f32 0.5, %v826_v37 }
 0x70b   :  { %v828_v38 = vsub.f32 1.5, %v827_v33 }
 0x70d   :  { %v829_v39 = vmul.f32 %v1829_v32, %v828_v38 }
 0x70f   :  { %v833_v42 = vsel %vm832_vm7, %v1829_v32, %v829_v39 }
 0x710   :  { %v835_v43 = vmul.f32 %v833_v42, %v811_v41 }
 0x712   :  { %v840_v44 = vmul.f32 %v1784_v28, %v835_v43 }
 0x714   :  { %v2100_v45 = vadd.f32 %v1785_v25, %v840_v44 }
 0x716   :  { %1743 = vmatmul.msk.f32.gmra.mxu1 %vm95_vm2, %v2100_v45  ;;  %1745 = vmatmul.msk.f32.gmra.mxu3 %vm95_vm2, %v2100_v45 }
 0x717   :  { %1747 = vmatmul.msk.f32.gmra.mxu0 %vm95_vm2, %v2100_v45  ;;  %1749 = vmatmul.msk.f32.gmra.mxu2 %vm95_vm2, %v2100_v45 }
 0x71e   :  { %1750 = vmatmul.msk.f32.vlgmr.msra.gmra.mxu1 %vm95_vm2, %v2089_v34  ;;  %1752 = vmatmul.msk.f32.vlgmr.msra.gmra.mxu3 %vm95_vm2, %v2089_v34 }
 0x726   :  { %1751 = vmatmul.msk.f32.gmra.mxu1 %vm95_vm2, %v2100_v45  ;;  %1753 = vmatmul.msk.f32.gmra.mxu3 %vm95_vm2, %v2100_v45 }
 0x784   :  { %v907_v49 = vpop.f32.mrf.mxu1 }
 0x785   :  { %v953_v48 = vpop.f32.mrf.mxu0  ;;  %v908_v51 = vadd.f32 %v907_v49, %v872_v47 }
 0x786   :  { %v954_v50 = vadd.f32 %v953_v48, %v874_v46 }
 0x788   :  { %1043 = vmatpush.xpose.msra.mxu0 %v954_v50 }
 0x78a   :  { %v930_v52 = vpop.f32.mrf.mxu3 }
 0x78b   :  { %1044 = vmatmul.f32.vlgmr.msra.gmra.mxu0 %v908_v51  ;;  %v976_v54 = vpop.f32.mrf.mxu2  ;;  %v931_v6 = vadd.f32 %v930_v52, %v873_v2 }
 0x78c   :  { %v977_v58 = vadd.f32 %v976_v54, %v875_v53 }
 0x793   :  { %v910_v55 = vpop.f32.mrf.mxu1 }
 0x794   :  { %v956_v56 = vpop.f32.mrf.mxu0  ;;  %v911_v59 = vadd.f32 %v910_v55, %v872_v47  ;;  %v1256_v55 = vld [vmem:[#allocation2 + $0x240] sm:$0xff] }
 0x795   :  { %v957_v57 = vadd.f32 %v956_v56, %v874_v46  ;;  %v1254_v56 = vld [vmem:[#allocation2 + $0x160] sm:$0xff] }
 0x797   :  { %1063 = vmatpush.xpose.msra.mxu2 %v957_v57  ;;  %v1252_v57 = vld [vmem:[#allocation2 + $0x80] sm:$0xff] }
 0x799   :  { %v933_v61 = vpop.f32.mrf.mxu3 }
 0x79a   :  { %v979_v62 = vpop.f32.mrf.mxu2  ;;  %1064 = vmatmul.f32.vlgmr.msra.gmra.mxu2 %v911_v59  ;;  %v934_v4 = vadd.f32 %v933_v61, %v873_v2 }
 0x79b   :  { %1155 = vmatpush.xpose.msrb.mxu2 %v977_v58  ;;  %v980_v63 = vadd.f32 %v979_v62, %v875_v53  ;;  %v999_v0 = vpop.f32.mrf.mxu1  ;;  %v1258_v53 = vld [vmem:[#allocation2 + $0x320] sm:$0xff] }
 0x79c   :  { %v1000_v3 = vadd.f32 %v999_v0, %v876_v60 }
 0x79d   :  { %1175 = vmatpush.xpose.msrb.mxu3 %v980_v63 }
 0x79e   :  { %1112 = vmatpush.msrb.mxu0 %v1000_v3 }
 0x79f   :  { %1276 = vmatpush.xpose.msra.mxu2 %v1258_v53 }
 0x7a0   :  { %1176 = vmatmul.f32.vlgmr.msrb.gmra.mxu3 %v934_v4  ;;  %v1259_v4 = vld [vmem:[#allocation2 + $0x328] sm:$0xff] }
 0x7a1   :  { %v1022_v7 = vpop.f32.mrf.mxu3  ;;  %1299 = vmatpush.xpose.msra.mxu3 %v1259_v4 }
 0x7a2   :  { %v1023_v8 = vadd.f32 %v1022_v7, %v877_v5  ;;  %1156 = vmatmul.f32.vlgmr.msrb.gmra.mxu2 %v931_v6  ;;  %v1255_v6 = vld [vmem:[#allocation2 + $0x168] sm:$0xff] }
 0x7a3   :  { %v1002_v9 = vpop.f32.mrf.mxu1  ;;  %1277 = vmatpush.xpose.msra.mxu2 %v1256_v55  ;;  %v1253_v7 = vld [vmem:[#allocation2 + $0x88] sm:$0xff] }
 0x7a4   :  { %v1003_v10 = vadd.f32 %v1002_v9, %v876_v60  ;;  %1224 = vmatpush.msra.mxu0 %v1023_v8 }
 0x7a6   :  { %1135 = vmatpush.msrb.mxu1 %v1003_v10 }
 0x7a7   :  { %1278 = vmatpush.xpose.msra.mxu2 %v1254_v56  ;;  %v1787_v56 = vld [vmem:[#allocation5 + $0x15] ss:$0 sm:$0xff] }
 0x7a9   :  { %v1025_v12 = vpop.f32.mrf.mxu3 }
 0x7aa   :  { %v1026_v13 = vadd.f32 %v1025_v12, %v877_v5  ;;  %v1257_v5 = vld [vmem:[#allocation2 + $0x248] sm:$0xff] }
 0x7ab   :  { %1279 = vmatpush.xpose.msra.mxu2 %v1252_v57  ;;  %1300 = vmatpush.xpose.msra.mxu3 %v1257_v5 }
 0x7ac   :  { %1247 = vmatpush.msra.mxu1 %v1026_v13  ;;  %v1786_v13 = vld [vmem:[#allocation5 + $0x14] ss:$0 sm:$0xff] }
 0x7af   :  { %1301 = vmatpush.xpose.msra.mxu3 %v1255_v6 }
 0x7b3   :  { %1302 = vmatpush.xpose.msra.mxu3 %v1253_v7 }
 0x808   :  { %v1045_v15 = vpop.f32.mrf.mxu0 }
 0x809   :  { %v1068_v16 = vmul.f32 0.25, %v1045_v15 }
 0x80b   :  { %v1070_v17 = vadd.f32 %v1068_v16, %v2038_v1 }
 0x80d   :  { %v1072_v18 = vsel %vm397_vm10, %v1070_v17, -inf }
 0x80e   :  { %1073 = vmax.xlane.f32.xlu0 %v1072_v18 }
 0x81d   :  { %v1065_v21 = vpop.f32.mrf.mxu2 }
 0x81e   :  { %v1069_v22 = vmul.f32 0.25, %v1065_v21 }
 0x820   :  { %v1071_v14 = vadd.f32 %v1069_v22, %v2044_v11 }
 0x822   :  { %v1075_v23 = vsel %vm397_vm10, %v1071_v14, -inf }
 0x823   :  { %v1177_v20 = vpop.f32.mrf.mxu3  ;;  %1076 = vmax.xlane.f32.xlu1 %v1075_v23 }
 0x824   :  { %v1181_v24 = vmul.f32 0.25, %v1177_v20 }
 0x825   :  { %v1157_v26 = vpop.f32.mrf.mxu2 }
 0x826   :  { %v1180_v19 = vmul.f32 0.25, %v1157_v26  ;;  %v1183_v27 = vadd.f32 %v1181_v24, %v2044_v11 }
 0x828   :  { %v1187_v28 = vsel %vm397_vm10, %v1183_v27, -inf  ;;  %v1182_v29 = vadd.f32 %v1180_v19, %v2038_v1 }
 0x829   :  { %1188 = vmax.xlane.f32.xlu0 %v1187_v28 }
 0x82a   :  { %v1184_v25 = vsel %vm397_vm10, %v1182_v29, -inf }
 0x82b   :  { %1185 = vmax.xlane.f32.xlu2 %v1184_v25 }
 0x881   :  { %v1074_v30 = vpop.xlane.xlu0 %1073 }
 0x882   :  { %v1078_v31 = vsub.f32 %v1070_v17, %v1074_v30  ;;  %v1374_v30 = vld [vmem:[#allocation2 + $0x250] sm:$0xff] }
 0x884   :  { %v1080_v32 = vmul.f32 1.442695, %v1078_v31  ;;  %v1373_v31 = vld [vmem:[#allocation2 + $0x170] sm:$0xff] }
 0x886   :  { %1830 = vpow2.f32 %v1080_v32  ;;  %v1372_v32 = vld [vmem:[#allocation2 + $0x90] sm:$0xff] }
 0x88c   :  { %v1831_v36 = vpop.eup %1830 }
 0x88d   :  { %v1084_v37 = vsel %vm397_vm10, %v1831_v36, 0.0 }
 0x88e   :  { %1085 = vadd.xlane.f32.xlu1 %v1084_v37 }
 0x896   :  { %v1077_v33 = vpop.xlane.xlu1 %1076 }
 0x897   :  { %v1079_v38 = vsub.f32 %v1071_v14, %v1077_v33 }
 0x899   :  { %v1082_v39 = vmul.f32 1.442695, %v1079_v38 }
 0x89b   :  { %1832 = vpow2.f32 %v1082_v39 }
 0x89c   :  { %v1189_v11 = vpop.xlane.xlu0 %1188 }
 0x89d   :  { %v1191_v41 = vsub.f32 %v1183_v27, %v1189_v11 }
 0x89e   :  { %v1186_v42 = vpop.xlane.xlu2 %1185 }
 0x89f   :  { %v1194_v1 = vmul.f32 1.442695, %v1191_v41  ;;  %v1190_v43 = vsub.f32 %v1182_v29, %v1186_v42 }
 0x8a1   :  { %v1833_v44 = vpop.eup %1832  ;;  %1834 = vpow2.f32 %v1194_v1  ;;  %v1192_v40 = vmul.f32 1.442695, %v1190_v43 }
 0x8a2   :  { %v1087_v46 = vsel %vm397_vm10, %v1833_v44, 0.0 }
 0x8a3   :  { %1836 = vpow2.f32 %v1192_v40  ;;  %1088 = vadd.xlane.f32.xlu2 %v1087_v46 }
 0x8a7   :  { %v1835_v47 = vpop.eup %1834 }
 0x8a8   :  { %v1199_v48 = vsel %vm397_vm10, %v1835_v47, 0.0 }
 0x8a9   :  { %v1837_v49 = vpop.eup %1836  ;;  %1200 = vadd.xlane.f32.xlu1 %v1199_v48 }
 0x8aa   :  { %v1196_v50 = vsel %vm397_vm10, %v1837_v49, 0.0 }
 0x8ab   :  { %1197 = vadd.xlane.f32.xlu0 %v1196_v50 }
 0x901   :  { %v1086_v51 = vpop.xlane.xlu1 %1085 }
 0x902   :  { %1838 = vrcp.f32 %v1086_v51 }
 0x908   :  { %v1839_v52 = vpop.eup %1838 }
 0x909   :  { %v1092_v54 = vmul.f32 %v1839_v52, %v1831_v36 }
 0x90b   :  { %1754 = vmatmul.msk.f32.vlgmr.msrb.gmra.mxu0 %vm397_vm10, %v1092_v54 }
 0x916   :  { %v1089_v58 = vpop.xlane.xlu2 %1088 }
 0x917   :  { %1840 = vrcp.f32 %v1089_v58 }
 0x91c   :  { %v1201_v59 = vpop.xlane.xlu1 %1200 }
 0x91d   :  { %v1841_v60 = vpop.eup %1840  ;;  %1842 = vrcp.f32 %v1201_v59 }
 0x91e   :  { %v1093_v61 = vmul.f32 %v1841_v60, %v1833_v44  ;;  %v1198_v62 = vpop.xlane.xlu0 %1197  ;;  %v1788_v60 = vld [vmem:[#allocation5 + $0x16] ss:$0 sm:$0xff] }
 0x91f   :  { %1844 = vrcp.f32 %v1198_v62 }
 0x920   :  { %1755 = vmatmul.msk.f32.vlgmr.msrb.gmra.mxu1 %vm397_vm10, %v1093_v61 }
 0x923   :  { %v1843_v63 = vpop.eup %1842 }
 0x924   :  { %v1205_v2 = vmul.f32 %v1843_v63, %v1835_v47 }
 0x925   :  { %v1845_v0 = vpop.eup %1844 }
 0x926   :  { %v1204_v3 = vmul.f32 %v1845_v0, %v1837_v49 }
 0x928   :  { %1756 = vmatmul.msk.f32.vlgmr.msra.gmra.mxu0 %vm397_vm10, %v1204_v3  ;;  %1757 = vmatmul.msk.f32.vlgmr.msra.gmra.mxu1 %vm397_vm10, %v1205_v2 }
 0x988   :  { %v1114_v8 = vpop.f32.mrf.mxu0 }
 0x989   :  { %1280 = vmatmul.f32.vlgmr.msra.gmra.mxu2 %v1114_v8  ;;  %v1430_v8 = vld [vmem:[#allocation2 + $0x338] sm:$0xff] }
 0x98a   :  { %1447 = vmatpush.xpose.msrb.mxu1 %v1430_v8 }
 0x99d   :  { %v1137_v9 = vpop.f32.mrf.mxu1 }
 0x99e   :  { %1283 = vmatmul.f32.gmra.mxu2 %v1137_v9  ;;  %v1429_v9 = vld [vmem:[#allocation2 + $0x258] sm:$0xff] }
 0x99f   :  { %1448 = vmatpush.xpose.msrb.mxu1 %v1429_v9 }
 0x9a5   :  { %v1226_v10 = vpop.f32.mrf.mxu0  ;;  %v1249_v12 = vpop.f32.mrf.mxu1 }
 0x9a6   :  { %1303 = vmatmul.f32.vlgmr.msra.gmra.mxu3 %v1226_v10  ;;  %v1428_v10 = vld [vmem:[#allocation2 + $0x178] sm:$0xff] }
 0x9a7   :  { %1449 = vmatpush.xpose.msrb.mxu1 %v1428_v10 }
 0x9ae   :  { %1306 = vmatmul.f32.gmra.mxu3 %v1249_v12  ;;  %v1427_v12 = vld [vmem:[#allocation2 + $0x98] sm:$0xff] }
 0x9af   :  { %1450 = vmatpush.xpose.msrb.mxu1 %v1427_v12 }
 0xa0c   :  { %v1281_v15 = vpop.f32.mrf.mxu2 }
 0xa0d   :  { %v1282_v16 = vadd.f32 %v1786_v13, %v1281_v15 }
 0xa21   :  { %v1284_v22 = vpop.f32.mrf.mxu2 }
 0xa22   :  { %v1285_v20 = vadd.f32 %v1786_v13, %v1284_v22  ;;  %v1789_v13 = vld [vmem:[#allocation5 + $0x13] ss:$0 sm:$0xff] }
 0xa29   :  { %v1304_v17 = vpop.f32.mrf.mxu3 }
 0xa2a   :  { %v1305_v18 = vadd.f32 %v1304_v17, %v1282_v16 }
 0xa2c   :  { %v1310_v21 = vadd.f32 %v1305_v18, %v2089_v34  ;;  %v1375_v34 = vld [vmem:[#allocation2 + $0x330] sm:$0xff] }
 0xa2d   :  { %1398 = vmatpush.msrb.mxu0 %v1375_v34 }
 0xa2e   :  { %v1314_v14 = vsel %vm95_vm2, %v1310_v21, 0.0  ;;  %v1322_v23 = vmul.f32 %v1310_v21, %v1310_v21 }
 0xa2f   :  { %1315 = vadd.xlane.f32.xlu2 %v1314_v14  ;;  %1399 = vmatpush.msrb.mxu0 %v1374_v30 }
 0xa30   :  { %v1324_v24 = vsel %vm95_vm2, %v1322_v23, 0.0 }
 0xa31   :  { %1325 = vadd.xlane.f32.xlu0 %v1324_v24  ;;  %v1307_v26 = vpop.f32.mrf.mxu3  ;;  %1400 = vmatpush.msrb.mxu0 %v1373_v31 }
 0xa32   :  { %v1308_v19 = vadd.f32 %v1307_v26, %v1285_v20 }
 0xa33   :  { %1401 = vmatpush.msrb.mxu0 %v1372_v32 }
 0xa34   :  { %v1311_v27 = vadd.f32 %v1308_v19, %v2100_v45 }
 0xa36   :  { %v1317_v28 = vsel %vm95_vm2, %v1311_v27, 0.0  ;;  %v1323_v29 = vmul.f32 %v1311_v27, %v1311_v27 }
 0xa37   :  { %1318 = vadd.xlane.f32.xlu1 %v1317_v28 }
 0xa38   :  { %v1327_v25 = vsel %vm95_vm2, %v1323_v29, 0.0 }
 0xa39   :  { %1328 = vadd.xlane.f32.xlu2 %v1327_v25 }
 0xaa2   :  { %v1316_v36 = vpop.xlane.xlu2 %1315 }
 0xaa3   :  { %v1320_v37 = vmul.f32 %v1316_v36, %v1999_v35 }
 0xaa4   :  { %v1326_v33 = vpop.xlane.xlu0 %1325 }
 0xaa5   :  { %v1332_v45 = vmul.f32 %v1320_v37, %v1320_v37  ;;  %v1330_v38 = vmul.f32 %v1326_v33, %v1999_v35  ;;  %v1336_v55 = vsub.f32 %v1310_v21, %v1320_v37  ;;  %v1790_v33 = vld [vmem:[#allocation5 + $0x17] ss:$0 sm:$0xff] }
 0xaa7   :  { %v1334_v39 = vsub.f32 %v1330_v38, %v1332_v45 }
 0xaa9   :  { %v1338_v11 = vadd.f32 1e-12, %v1334_v39 }
 0xaaa   :  { %v1319_v41 = vpop.xlane.xlu1 %1318 }
 0xaab   :  { %1846 = vrsqrt.f32 %v1338_v11  ;;  %v1321_v42 = vmul.f32 %v1319_v41, %v1999_v35  ;;  %vm1346_vm9 = vweird.f32 %v1338_v11 }
 0xaac   :  { %v1329_v1 = vpop.xlane.xlu2 %1328 }
 0xaad   :  { %v1333_v43 = vmul.f32 %v1321_v42, %v1321_v42  ;;  %v1331_v44 = vmul.f32 %v1329_v1, %v1999_v35  ;;  %v1337_v3 = vsub.f32 %v1311_v27, %v1321_v42 }
 0xaaf   :  { %v1335_v40 = vsub.f32 %v1331_v44, %v1333_v43 }
 0xab1   :  { %v1847_v46 = vpop.eup %1846  ;;  %v1339_v47 = vadd.f32 1e-12, %v1335_v40 }
 0xab2   :  { %v1341_v48 = vmul.f32 %v1847_v46, %v1338_v11  ;;  %vm1347_vm8 = vweird.f32 %v1847_v46 }
 0xab3   :  { %1848 = vrsqrt.f32 %v1339_v47  ;;  %vm1348_vm10 = vmor %vm1346_vm9, %vm1347_vm8  ;;  %vm1356_vm12 = vweird.f32 %v1339_v47 }
 0xab4   :  { %v1342_v49 = vmul.f32 %v1847_v46, %v1341_v48 }
 0xab6   :  { %v1343_v50 = vmul.f32 0.5, %v1342_v49  ;;  %v1528_v49 = vld [vmem:[#allocation2 + $0x350] sm:$0xff] }
 0xab7   :  { %1548 = vmatpush.msra.mxu0 %v1528_v49 }
 0xab8   :  { %v1344_v51 = vsub.f32 1.5, %v1343_v50 }
 0xab9   :  { %v1849_v52 = vpop.eup %1848 }
 0xaba   :  { %v1345_v53 = vmul.f32 %v1847_v46, %v1344_v51  ;;  %v1351_v54 = vmul.f32 %v1849_v52, %v1339_v47  ;;  %vm1357_vm11 = vweird.f32 %v1849_v52  ;;  %v1527_v51 = vld [vmem:[#allocation2 + $0x270] sm:$0xff] }
 0xabb   :  { %vm1358_vm13 = vmor %vm1356_vm12, %vm1357_vm11  ;;  %1549 = vmatpush.msra.mxu0 %v1527_v51 }
 0xabc   :  { %v1349_v57 = vsel %vm1348_vm10, %v1847_v46, %v1345_v53  ;;  %v1352_v58 = vmul.f32 %v1849_v52, %v1351_v54  ;;  %v1526_v54 = vld [vmem:[#allocation2 + $0x190] sm:$0xff] }
 0xabd   :  { %v1360_v59 = vmul.f32 %v1349_v57, %v1336_v55  ;;  %v1525_v57 = vld [vmem:[#allocation2 + $0xb0] sm:$0xff]  ;;  %1550 = vmatpush.msra.mxu0 %v1526_v54 }
 0xabe   :  { %v1353_v61 = vmul.f32 0.5, %v1352_v58  ;;  %v1650_v54 = vld [vmem:[#allocation2 + $0x1b0] sm:$0xff] }
 0xabf   :  { %v1365_v62 = vmul.f32 %v1787_v56, %v1360_v59  ;;  %1551 = vmatpush.msra.mxu0 %v1525_v57 }
 0xac0   :  { %v1354_v63 = vsub.f32 1.5, %v1353_v61 }
 0xac1   :  { %v1370_v0 = vadd.f32 %v1788_v60, %v1365_v62 }
 0xac2   :  { %v1355_v2 = vmul.f32 %v1849_v52, %v1354_v63 }
 0xac3   :  { %1758 = vmatmul.msk.f32.vlgmr.msrb.gmra.mxu0 %vm95_vm2, %v1370_v0 }
 0xac4   :  { %v1359_v4 = vsel %vm1358_vm13, %v1849_v52, %v1355_v2 }
 0xac5   :  { %v1361_v5 = vmul.f32 %v1359_v4, %v1337_v3 }
 0xac7   :  { %v1366_v6 = vmul.f32 %v1787_v56, %v1361_v5 }
 0xac9   :  { %v1371_v7 = vadd.f32 %v1788_v60, %v1366_v6 }
 0xacb   :  { %1759 = vmatmul.msk.f32.gmra.mxu0 %vm95_vm2, %v1371_v7 }
 0xb40   :  { %v1403_v15 = vpop.f32.mrf.mxu0 }
 0xb41   :  { %v1404_v16 = vadd.f32 %v1789_v13, %v1403_v15  ;;  %v1791_v15 = vld [vmem:[#allocation5 + $0x18] ss:$0 sm:$0xff] }
 0xb43   :  { %v1409_v17 = vmul.f32 %v1404_v16, %v1404_v16 }
 0xb45   :  { %v1411_v18 = vmul.f32 %v1409_v17, %v1404_v16 }
 0xb47   :  { %v1413_v21 = vmul.f32 0.044715, %v1411_v18 }
 0xb48   :  { %v1406_v22 = vpop.f32.mrf.mxu0 }
 0xb49   :  { %v1415_v14 = vadd.f32 %v1413_v21, %v1404_v16  ;;  %v1407_v23 = vadd.f32 %v1789_v13, %v1406_v22  ;;  %v1792_v22 = vld [vmem:[#allocation5 + $0x19] ss:$0 sm:$0xff] }
 0xb4b   :  { %v1417_v20 = vmul.f32 0.7978846, %v1415_v14  ;;  %v1410_v24 = vmul.f32 %v1407_v23, %v1407_v23 }
 0xb4d   :  { %1850 = vtanh.f32 %v1417_v20  ;;  %v1412_v26 = vmul.f32 %v1410_v24, %v1407_v23 }
 0xb4f   :  { %v1414_v19 = vmul.f32 0.044715, %v1412_v26 }
 0xb51   :  { %v1416_v27 = vadd.f32 %v1414_v19, %v1407_v23 }
 0xb53   :  { %v1851_v28 = vpop.eup %1850  ;;  %v1418_v29 = vmul.f32 0.7978846, %v1416_v27 }
 0xb54   :  { %v1421_v25 = vadd.f32 1.0, %v1851_v28 }
 0xb55   :  { %1852 = vtanh.f32 %v1418_v29 }
 0xb56   :  { %v1423_v34 = vmul.f32 0.5, %v1421_v25  ;;  %v1560_v25 = vld [vmem:[#allocation2 + $0x358] sm:$0xff] }
 0xb57   :  { %1580 = vmatpush.msrb.mxu2 %v1560_v25 }
 0xb58   :  { %v1425_v30 = vmul.f32 %v1423_v34, %v1404_v16  ;;  %v1559_v34 = vld [vmem:[#allocation2 + $0x278] sm:$0xff] }
 0xb59   :  { %1581 = vmatpush.msrb.mxu2 %v1559_v34 }
 0xb5a   :  { %1451 = vmatmul.f32.vlgmr.msrb.gmra.mxu1 %v1425_v30  ;;  %v1558_v30 = vld [vmem:[#allocation2 + $0x198] sm:$0xff] }
 0xb5b   :  { %v1853_v31 = vpop.eup %1852  ;;  %1582 = vmatpush.msrb.mxu2 %v1558_v30 }
 0xb5c   :  { %v1422_v32 = vadd.f32 1.0, %v1853_v31  ;;  %v1557_v31 = vld [vmem:[#allocation2 + $0xb8] sm:$0xff] }
 0xb5d   :  { %1583 = vmatpush.msrb.mxu2 %v1557_v31 }
 0xb5e   :  { %v1424_v36 = vmul.f32 0.5, %v1422_v32  ;;  %v1793_v32 = vld [vmem:[#allocation5 + $0x1c] ss:$0 sm:$0xff] }
 0xb60   :  { %v1426_v37 = vmul.f32 %v1424_v36, %v1407_v23 }
 0xb62   :  { %1454 = vmatmul.f32.gmra.mxu1 %v1426_v37 }
 0xbd7   :  { %v1452_v45 = vpop.f32.mrf.mxu1 }
 0xbd8   :  { %v1453_v38 = vadd.f32 %v1790_v33, %v1452_v45  ;;  %v1595_v45 = vld [vmem:[#allocation2 + $0x360] sm:$0xff] }
 0xbd9   :  { %1618 = vmatpush.msrb.mxu3 %v1595_v45 }
 0xbda   :  { %v2146_v39 = vadd.f32 %v1453_v38, %v1370_v0  ;;  %v1596_v38 = vld [vmem:[#allocation2 + $0x368] sm:$0xff] }
 0xbdb   :  { %1638 = vmatpush.msrb.mxu0 %v1596_v38 }
 0xbdc   :  { %v1462_v11 = vsel %vm95_vm2, %v2146_v39, 0.0  ;;  %v1470_v46 = vmul.f32 %v2146_v39, %v2146_v39 }
 0xbdd   :  { %1463 = vadd.xlane.f32.xlu1 %v1462_v11  ;;  %v1594_v11 = vld [vmem:[#allocation2 + $0x288] sm:$0xff] }
 0xbde   :  { %v1472_v47 = vsel %vm95_vm2, %v1470_v46, 0.0  ;;  %1639 = vmatpush.msrb.mxu0 %v1594_v11  ;;  %v1653_v46 = vld [vmem:[#allocation2 + $0x298] sm:$0xff] }
 0xbdf   :  { %v1455_v41 = vpop.f32.mrf.mxu1 }
 0xbe0   :  { %v1456_v42 = vadd.f32 %v1790_v33, %v1455_v41  ;;  %v1591_v41 = vld [vmem:[#allocation2 + $0x1a0] sm:$0xff] }
 0xbe2   :  { %v1459_v1 = vadd.f32 %v1456_v42, %v1371_v7  ;;  %v1592_v42 = vld [vmem:[#allocation2 + $0x1a8] sm:$0xff] }
 0xbe3   :  { %1640 = vmatpush.msrb.mxu0 %v1592_v42 }
 0xbe4   :  { %v1465_v43 = vsel %vm95_vm2, %v1459_v1, 0.0  ;;  %v1471_v44 = vmul.f32 %v1459_v1, %v1459_v1 }
 0xbe5   :  { %1466 = vadd.xlane.f32.xlu0 %v1465_v43  ;;  %v1590_v43 = vld [vmem:[#allocation2 + $0xc8] sm:$0xff] }
 0xbe6   :  { %v1475_v40 = vsel %vm95_vm2, %v1471_v44, 0.0  ;;  %1641 = vmatpush.msrb.mxu0 %v1590_v43  ;;  %v1655_v44 = vld [vmem:[#allocation2 + $0x378] sm:$0xff] }
 0xbe7   :  { %1476 = vadd.xlane.f32.xlu2 %v1475_v40  ;;  %v1654_v40 = vld [vmem:[#allocation2 + $0x370] sm:$0xff]  ;;  %1692 = vmatpush.xpose.msra.mxu2 %v1655_v44 }
 0xbe8   :  { %1672 = vmatpush.xpose.msra.mxu1 %v1654_v40 }
 0xbeb   :  { %1693 = vmatpush.xpose.msra.mxu2 %v1653_v46 }
 0xbed   :  { %1473 = vadd.xlane.f32.xlu0 %v1472_v47  ;;  %v1651_v47 = vld [vmem:[#allocation2 + $0x1b8] sm:$0xff] }
 0xbef   :  { %1694 = vmatpush.xpose.msra.mxu2 %v1651_v47 }
 0xc50   :  { %v1464_v52 = vpop.xlane.xlu1 %1463 }
 0xc51   :  { %v1468_v58 = vmul.f32 %v1464_v52, %v1999_v35  ;;  %v1652_v52 = vld [vmem:[#allocation2 + $0x290] sm:$0xff] }
 0xc52   :  { %1673 = vmatpush.xpose.msra.mxu1 %v1652_v52 }
 0xc53   :  { %v1480_v62 = vmul.f32 %v1468_v58, %v1468_v58  ;;  %v1484_v23 = vsub.f32 %v2146_v39, %v1468_v58  ;;  %v1593_v39 = vld [vmem:[#allocation2 + $0x280] sm:$0xff] }
 0xc54   :  { %1619 = vmatpush.msrb.mxu3 %v1593_v39 }
 0xc56   :  { %1620 = vmatpush.msrb.mxu3 %v1591_v41  ;;  %1674 = vmatpush.xpose.msra.mxu1 %v1650_v54 }
 0xc58   :  { %v1467_v48 = vpop.xlane.xlu0 %1466 }
 0xc59   :  { %v1469_v50 = vmul.f32 %v1467_v48, %v1999_v35  ;;  %v1794_v48 = vld [vmem:[#allocation5 + $0x1d] ss:$0 sm:$0xff] }
 0xc5a   :  { %v1477_v53 = vpop.xlane.xlu2 %1476 }
 0xc5b   :  { %v1481_v55 = vmul.f32 %v1469_v50, %v1469_v50  ;;  %v1479_v56 = vmul.f32 %v1477_v53, %v1999_v35  ;;  %v1485_v13 = vsub.f32 %v1459_v1, %v1469_v50  ;;  %v1589_v1 = vld [vmem:[#allocation2 + $0xc0] sm:$0xff]  ;;  %v1649_v53 = vld [vmem:[#allocation2 + $0xd8] sm:$0xff] }
 0xc5c   :  { %1621 = vmatpush.msrb.mxu3 %v1589_v1  ;;  %1695 = vmatpush.xpose.msra.mxu2 %v1649_v53 }
 0xc5d   :  { %v1483_v59 = vsub.f32 %v1479_v56, %v1481_v55  ;;  %v1648_v55 = vld [vmem:[#allocation2 + $0xd0] sm:$0xff]  ;;  %v1597_v56 = vld [vmem:[#allocation5 + $0x1f] sm:$0x3] }
 0xc5e   :  { %1675 = vmatpush.xpose.msra.mxu1 %v1648_v55  ;;  %v1600_v57 = vperm.slane %v1597_v56, 1 }
 0xc5f   :  { %v1487_v60 = vadd.f32 1e-12, %v1483_v59 }
 0xc60   :  { %v1474_v61 = vpop.xlane.xlu0 %1473 }
 0xc61   :  { %1854 = vrsqrt.f32 %v1487_v60  ;;  %v1478_v63 = vmul.f32 %v1474_v61, %v1999_v35  ;;  %vm1504_vm15 = vweird.f32 %v1487_v60  ;;  %v1599_v61 = vperm.slane %v1597_v56, 0 }
 0xc63   :  { %v1482_v0 = vsub.f32 %v1478_v63, %v1480_v62 }
 0xc65   :  { %v1486_v2 = vadd.f32 1e-12, %v1482_v0 }
 0xc67   :  { %v1855_v3 = vpop.eup %1854  ;;  %1856 = vrsqrt.f32 %v1486_v2  ;;  %vm1494_vm3 = vweird.f32 %v1486_v2 }
 0xc68   :  { %v1499_v4 = vmul.f32 %v1855_v3, %v1487_v60  ;;  %vm1505_vm14 = vweird.f32 %v1855_v3 }
 0xc69   :  { %vm1506_vm0 = vmor %vm1504_vm15, %vm1505_vm14 }
 0xc6a   :  { %v1500_v5 = vmul.f32 %v1855_v3, %v1499_v4 }
 0xc6c   :  { %v1501_v6 = vmul.f32 0.5, %v1500_v5 }
 0xc6d   :  { %v1857_v7 = vpop.eup %1856 }
 0xc6e   :  { %v1502_v8 = vsub.f32 1.5, %v1501_v6  ;;  %v1489_v9 = vmul.f32 %v1857_v7, %v1486_v2  ;;  %vm1495_vm1 = vweird.f32 %v1857_v7  ;;  %v1795_v2 = vld [vmem:[#allocation5 + $0x1e] ss:$0 sm:$0xff] }
 0xc6f   :  { %vm1496_vm4 = vmor %vm1494_vm3, %vm1495_vm1 }
 0xc70   :  { %v1503_v10 = vmul.f32 %v1855_v3, %v1502_v8  ;;  %v1490_v12 = vmul.f32 %v1857_v7, %v1489_v9 }
 0xc72   :  { %v1507_v16 = vsel %vm1506_vm0, %v1855_v3, %v1503_v10  ;;  %v1491_v17 = vmul.f32 0.5, %v1490_v12 }
 0xc73   :  { %v1509_v35 = vmul.f32 %v1507_v16, %v1485_v13 }
 0xc74   :  { %v1492_v18 = vsub.f32 1.5, %v1491_v17 }
 0xc75   :  { %v1514_v21 = vmul.f32 %v1791_v15, %v1509_v35 }
 0xc76   :  { %v1493_v14 = vmul.f32 %v1857_v7, %v1492_v18 }
 0xc77   :  { %v1519_v26 = vadd.f32 %v1792_v22, %v1514_v21 }
 0xc78   :  { %v1497_v20 = vsel %vm1496_vm4, %v1857_v7, %v1493_v14 }
 0xc79   :  { %v1508_v24 = vmul.f32 %v1497_v20, %v1484_v23  ;;  %v1521_v28 = vrot.slane %v1519_v26, 7 }
 0xc7b   :  { %v1513_v19 = vmul.f32 %v1791_v15, %v1508_v24 }
 0xc7d   :  { %v1518_v27 = vadd.f32 %v1792_v22, %v1513_v19 }
 0xc7f   :  { %v1524_v29 = vsel %vm1523_vm5, %v1518_v27, %v1521_v28 }
 0xc80   :  { %1760 = vmatmul.msk.f32.vlgmr.msra.gmra.mxu0 %vm95_vm2, %v1524_v29 }
 0xcfd   :  { %v1553_v36 = vpop.f32.mrf.mxu0 }
 0xcfe   :  { %v1554_v37 = vadd.f32 %v1793_v32, %v1553_v36 }
 0xd00   :  { %1858 = vtanh.f32 %v1554_v37 }
 0xd06   :  { %v1859_v33 = vpop.eup %1858 }
 0xd07   :  { %1761 = vmatmul.msk.f32.vlgmr.msrb.gmra.mxu2 %vm95_vm2, %v1859_v33 }
 0xd8a   :  { %v1585_v49 = vpop.f32.mrf.mxu2 }
 0xd8b   :  { %v1586_v50 = vadd.f32 %v1794_v48, %v1585_v49 }
 0xd8d   :  { %1860 = vtanh.f32 %v1586_v50 }
 0xd93   :  { %v1861_v51 = vpop.eup %1860 }
 0xd94   :  { %1762 = vmatmul.msk.f32.vlgmr.msrb.gmra.mxu3 %vm95_vm2, %v1861_v51  ;;  %1763 = vmatmul.msk.f32.vlgmr.msrb.gmra.mxu0 %vm95_vm2, %v1861_v51  ;;  %vm1700_vm2 = vcmask 254976  }
 0xe11   :  { %v1643_v58 = vpop.f32.mrf.mxu0 }
 0xe12   :  { %v1644_v59 = vadd.f32 %v1643_v58, %v1600_v57 }
 0xe14   :  { %v1647_v60 = vmax.f32 %v1644_v59, 0.0 }
 0xe16   :  { %1696 = vmatmul.f32.vlgmr.msra.gmra.mxu2 %v1647_v60 }
 0xe17   :  { %v1623_v62 = vpop.f32.mrf.mxu3 }
 0xe18   :  { %v1624_v63 = vadd.f32 %v1623_v62, %v1599_v61 }
 0xe1a   :  { %v1646_v0 = vmax.f32 %v1624_v63, 0.0 }
 0xe1c   :  { %1676 = vmatmul.f32.vlgmr.msra.gmra.mxu1 %v1646_v0 }
 0xe99   :  { %v1677_v3 = vpop.f32.mrf.mxu1  ;;  %v1697_v5 = vpop.f32.mrf.mxu2 }
 0xe9a   :  { %v1678_v4 = vadd.f32 %v1795_v2, %v1677_v3 }
 0xe9c   :  { %v1698_v6 = vadd.f32 %v1697_v5, %v1678_v4 }
 0xe9e   :  { %1701 = vst.msk [vmem:[#allocation7] sm:$0x3] %vm1700_vm2, %v1698_v6 }
 0xe9f   :  { %1712 = dma.vmem_to_hbm [thread:$0]  %s1708_s30, 32, %s1710_s7, [#allocation4]  }
 0xea0   :  { %1938 = dma.done.wait [#allocation4], 32  }
 0xea1   :  { %1939 = vsyncadd [#allocation4], 4294967264 }
 0xea2   :  { %1717 = vsyncpa [#allocation3], 1 }
 0xea3   :  { %1718 = vsyncpa [#allocation6], 1 }
 0xea4   :  { %1719 = vsyncpa [#allocation4], 1 }

</bundles_post_ra>
